<compile_context>
chip_gen: v5e
topology: v5e:2x2
jax: 0.10.0
libtpu: 0.0.40
codegen_flags: <defaults>
</compile_context>

<pallas_src>
import functools

import jax
import jax.numpy as jnp
from jax.experimental import pallas as pl
from jax.experimental.pallas import tpu as pltpu

LANE = 128
SUB = 8
EPS = 1e-5  # torch.nn.BatchNorm2d default


def _ceil_to(x, m):
    return (x + m - 1) // m * m


# ---------------------------------------------------------------------------
# Wrapper-side layout plumbing (pure data movement, no significant FLOPs).
# ---------------------------------------------------------------------------
def _flat_sizes(H, W):
    Hp, Wp = H + 2, W + 2
    F = Hp * Wp
    Fp = _ceil_to(F, LANE)
    return Hp, Wp, F, Fp


def nhwc_to_cpad(x, c_pad):
    """(N,H,W,C) -> (c_pad, N*Fpad): zero conv ring + zero channel/flat padding."""
    N, H, W, C = x.shape
    _, _, F, Fp = _flat_sizes(H, W)
    xp = jnp.pad(x, ((0, 0), (1, 1), (1, 1), (0, 0)))
    xc = xp.transpose(3, 0, 1, 2).reshape(C, N, F)
    xc = jnp.pad(xc, ((0, c_pad - C), (0, 0), (0, Fp - F)))
    return xc.reshape(c_pad, N * Fp)


def cpad_to_nhwc(xc, N, H, W, C):
    """Inverse of nhwc_to_cpad (drops ring, flat tail and channel padding)."""
    Hp, Wp, F, Fp = _flat_sizes(H, W)
    x = xc[:C].reshape(C, N, Fp)[:, :, :F].reshape(C, N, Hp, Wp)
    return x[:, :, 1:H + 1, 1:W + 1].transpose(1, 2, 3, 0)


def interior_mask(N, H, W):
    """(1, N*Fpad) f32 mask: 1 on real (interior) pixels, 0 on ring / flat padding."""
    Hp, Wp, F, Fp = _flat_sizes(H, W)
    m = jnp.zeros((Hp, Wp), jnp.float32).at[1:H + 1, 1:W + 1].set(1.0)
    m = jnp.pad(m.reshape(F), (0, Fp - F))
    return jnp.tile(m, N).reshape(1, N * Fp)


def avgpool2_cpad(x_c, N, H, W, C, c_pad):
    x = cpad_to_nhwc(x_c, N, H, W, C)
    xl = x.reshape(N, H // 2, 2, W // 2, 2, C).mean(axis=(2, 4))
    return nhwc_to_cpad(xl, c_pad)


def upsample2_cpad(z_c, N, Hl, Wl, C, c_pad):
    z = cpad_to_nhwc(z_c, N, Hl, Wl, C)
    zu = jnp.repeat(jnp.repeat(z, 2, axis=1), 2, axis=2)
    return nhwc_to_cpad(zu, c_pad)


# ---------------------------------------------------------------------------
# In-kernel 3x3 patch construction (no HBM im2col).
# ---------------------------------------------------------------------------
def _patches3x3(x, wp):
    """x: (Cp, P) one image in padded-flat layout -> (9*Cp, P), tap-major rows.

    out[t*Cp + c, q] = x[c, (q + off_t) mod P], off_t = (ky-1)*wp + (kx-1).
    Interior pixels never see the circular wrap (their shifted reads stay inside the
    image's real padded region), so wrap garbage only lands on masked ring positions.
    """
    P = x.shape[-1]
    xx = jnp.concatenate([x, x], axis=-1)      # aligned lane concat (P % 128 == 0)
    taps = []
    for ky in range(3):
        for kx in range(3):
            off = (ky - 1) * wp + (kx - 1)
            s = off % P
            taps.append(xx[:, s:s + P])        # lane-shifted view of the resident tile
    return jnp.concatenate(taps, axis=0)       # aligned sublane concat (Cp % 8 == 0)


# ---------------------------------------------------------------------------
# Pass A: all LOW-resolution convs (l2h, and K-fused h2l + l2l) + low-branch stats.
# ---------------------------------------------------------------------------
def _low_kernel(wp_l, xl_ref, xhp_ref, w_l2h_ref, w_low_ref, mask_ref,
                zl2h_ref, zl_ref, stats_ref):
    p_l = _patches3x3(xl_ref[...], wp_l)                 # (9*Cil, P) f32
    p_h = _patches3x3(xhp_ref[...], wp_l)                # (9*Cih, P) f32 (pooled high)

    # l->h conv stays at LOW resolution; the wrapper nearest-upsamples this small result.
    zl2h_ref[...] = jnp.dot(w_l2h_ref[...], p_l.astype(jnp.bfloat16),
                            preferred_element_type=jnp.float32)

    # low branch: h2l + l2l fused along K into a single MXU pass.
    p_cat = jnp.concatenate([p_h, p_l], axis=0).astype(jnp.bfloat16)
    zl = jnp.dot(w_low_ref[...], p_cat, preferred_element_type=jnp.float32)
    zl_ref[...] = zl

    zm = zl * mask_ref[...]                              # drop ring / padding from stats
    s1 = jnp.sum(zm, axis=1, keepdims=True)
    s2 = jnp.sum(zm * zl, axis=1, keepdims=True)
    stats_ref[...] = jnp.concatenate([s1, s2], axis=1)[None]   # (1, C, 2)


# ---------------------------------------------------------------------------
# Pass B: HIGH-resolution conv (h2h) + upsampled l2h add + high-branch stats.
# ---------------------------------------------------------------------------
def _high_kernel(wp_h, xh_ref, up_ref, w_h2h_ref, mask_ref,
                 zh_ref, stats_ref):
    p_h = _patches3x3(xh_ref[...], wp_h).astype(jnp.bfloat16)
    zh = jnp.dot(w_h2h_ref[...], p_h, preferred_element_type=jnp.float32)
    zh = zh + up_ref[...]
    zh_ref[...] = zh

    zm = zh * mask_ref[...]
    s1 = jnp.sum(zm, axis=1, keepdims=True)
    s2 = jnp.sum(zm * zh, axis=1, keepdims=True)
    stats_ref[...] = jnp.concatenate([s1, s2], axis=1)[None]   # (1, C, 2)


# ---------------------------------------------------------------------------
# Pass C: normalize (precomputed scale/shift) + PReLU (+ residual) + re-zero ring.
# ---------------------------------------------------------------------------
def _bn_act_kernel(with_res, *refs):
    if with_res:
        (zh_ref, zl_ref, sc_h, sh_h, sc_l, sh_l, mh, ml, alpha_ref,
         rh, rl, yh_ref, yl_ref) = refs
    else:
        (zh_ref, zl_ref, sc_h, sh_h, sc_l, sh_l, mh, ml, alpha_ref,
         yh_ref, yl_ref) = refs
        rh = rl = None

    alpha = alpha_ref[0]  # PReLU slope (one nn.PReLU per Conv_BN_ACT, shared h/l)

    def branch(z_ref, scale_ref, shift_ref, m_ref, r_ref, y_ref):
        y = z_ref[...] * scale_ref[...] + shift_ref[...]   # lane-dense FMA (broadcast C)
        y = jnp.where(y > 0, y, alpha * y)                 # PReLU
        if r_ref is not None:
            y = y + r_ref[...]
        y_ref[...] = (y * m_ref[...]).astype(y_ref.dtype)  # re-zero ring/padding

    branch(zh_ref, sc_h, sh_h, mh, rh, yh_ref)
    branch(zl_ref, sc_l, sh_l, ml, rl, yl_ref)


def _bn_affine(stats, gamma, beta, count):
    """Tiny XLA finalize: per-channel scale/shift from per-image partial sums.

    stats: (n_blocks, Cp, 2) with [:, :, 0]=sum, [:, :, 1]=sum of squares (masked).
    Padded channels have zero gamma -> scale=0, shift=0 -> outputs stay zero.
    """
    tot = jnp.sum(stats, axis=0)                      # (Cp, 2)
    mean = tot[:, 0:1] / count
    var = tot[:, 1:2] / count - mean * mean           # biased variance (train mode)
    scale = gamma * jax.lax.rsqrt(var + EPS)
    shift = beta - mean * scale
    return scale, shift


# ---------------------------------------------------------------------------
# One Conv_BN_ACT layer (three tiled, parallel pallas_calls).
# ---------------------------------------------------------------------------
def conv_bn_act_pallas(params, xh_c, xl_c, shape_info, residual=None):
    N, H, W, cih, cil, coh, col = shape_info
    Hl, Wl = H // 2, W // 2
    cihp, cilp = _ceil_to(cih, SUB), _ceil_to(cil, SUB)
    cohp, colp = _ceil_to(coh, SUB), _ceil_to(col, SUB)
    _, wp_h, _, Fh = _flat_sizes(H, W)
    _, wp_l, _, Fl = _flat_sizes(Hl, Wl)
    PH, PL = N * Fh, N * Fl
    n_blocks = N  # one image per grid step

    mask_h = interior_mask(N, H, W)
    mask_l = interior_mask(N, Hl, Wl)

    # Weights: (3,3,I,O) -> (O_pad, 9*I_pad) bf16, K ordered tap-major (matches patches).
    def wmat(w, cin_p, cout_p):
        k = jnp.pad(w, ((0, 0), (0, 0),
                        (0, cin_p - w.shape[2]), (0, cout_p - w.shape[3])))
        return k.transpose(3, 0, 1, 2).reshape(cout_p, 9 * cin_p).astype(jnp.bfloat16)

    w_h2h = wmat(params["w_h2h"], cihp, cohp)
    w_l2h = wmat(params["w_l2h"], cilp, cohp)
    w_low = jnp.concatenate([wmat(params["w_h2l"], cihp, colp),
                             wmat(params["w_l2l"], cilp, colp)], axis=1)

    def bn_vec(v, cp):
        return jnp.pad(v.astype(jnp.float32), (0, cp - v.shape[0])).reshape(cp, 1)

    g_h, b_h = bn_vec(params["gamma_h"], cohp), bn_vec(params["beta_h"], cohp)
    g_l, b_l = bn_vec(params["gamma_l"], colp), bn_vec(params["beta_l"], colp)
    alpha = params["prelu_alpha"].reshape(1).astype(jnp.float32)

    cparams = pltpu.CompilerParams(dimension_semantics=("parallel",),
                                   vmem_limit_bytes=32 * 1024 * 1024)

    # ----- Pass A: low-res convs + low-branch partial stats -----
    xh_pool_c = avgpool2_cpad(xh_c, N, H, W, cih, cihp)
    cost_a = pl.CostEstimate(
        flops=2 * PL * 9 * (cilp * cohp + (cihp + cilp) * colp),
        transcendentals=0,
        bytes_accessed=4 * PL * (cihp + 2 * cilp + cohp + colp))
    z_l2h_c, z_l_c, stats_l = pl.pallas_call(
        functools.partial(_low_kernel, wp_l),
        grid=(n_blocks,),
        in_specs=[
            pl.BlockSpec((cilp, Fl), lambda b: (0, b)),                 # x_l
            pl.BlockSpec((cihp, Fl), lambda b: (0, b)),                 # avgpool(x_h)
            pl.BlockSpec((cohp, 9 * cilp), lambda b: (0, 0)),           # w_l2h
            pl.BlockSpec((colp, 9 * (cihp + cilp)), lambda b: (0, 0)),  # w_h2l|w_l2l
            pl.BlockSpec((1, Fl), lambda b: (0, b)),                    # mask_l
        ],
        out_specs=(
            pl.BlockSpec((cohp, Fl), lambda b: (0, b)),
            pl.BlockSpec((colp, Fl), lambda b: (0, b)),
            pl.BlockSpec((1, colp, 2), lambda b: (b, 0, 0)),
        ),
        out_shape=(
            jax.ShapeDtypeStruct((cohp, PL), jnp.float32),
            jax.ShapeDtypeStruct((colp, PL), jnp.float32),
            jax.ShapeDtypeStruct((n_blocks, colp, 2), jnp.float32),
        ),
        compiler_params=cparams,
        cost_estimate=cost_a,
    )(xl_c, xh_pool_c, w_l2h, w_low, mask_l)

    # ----- Pass B: high-res conv + upsampled l2h + high-branch partial stats -----
    up_l2h_c = upsample2_cpad(z_l2h_c, N, Hl, Wl, coh, cohp)  # small result, 2x nearest
    cost_b = pl.CostEstimate(
        flops=2 * PH * 9 * cihp * cohp,
        transcendentals=0,
        bytes_accessed=4 * PH * (cihp + 2 * cohp))
    z_h_c, stats_h = pl.pallas_call(
        functools.partial(_high_kernel, wp_h),
        grid=(n_blocks,),
        in_specs=[
            pl.BlockSpec((cihp, Fh), lambda b: (0, b)),        # x_h
            pl.BlockSpec((cohp, Fh), lambda b: (0, b)),        # upsampled l2h conv
            pl.BlockSpec((cohp, 9 * cihp), lambda b: (0, 0)),  # w_h2h
            pl.BlockSpec((1, Fh), lambda b: (0, b)),           # mask_h
        ],
        out_specs=(
            pl.BlockSpec((cohp, Fh), lambda b: (0, b)),
            pl.BlockSpec((1, cohp, 2), lambda b: (b, 0, 0)),
        ),
        out_shape=(
            jax.ShapeDtypeStruct((cohp, PH), jnp.float32),
            jax.ShapeDtypeStruct((n_blocks, cohp, 2), jnp.float32),
        ),
        compiler_params=cparams,
        cost_estimate=cost_b,
    )(xh_c, up_l2h_c, w_h2h, mask_h)

    # ----- BN finalize (tiny per-channel vectors, plain XLA) -----
    cnt_h, cnt_l = float(N * H * W), float(N * Hl * Wl)
    scale_h, shift_h = _bn_affine(stats_h, g_h, b_h, cnt_h)
    scale_l, shift_l = _bn_affine(stats_l, g_l, b_l, cnt_l)

    # ----- Pass C: normalize + PReLU (+ residual), tiled, fully parallel, in-place -----
    with_res = residual is not None
    smem = pl.BlockSpec(memory_space=pltpu.MemorySpace.SMEM)
    in_specs = [
        pl.BlockSpec((cohp, Fh), lambda b: (0, b)),            # z_h (aliased -> y_h)
        pl.BlockSpec((colp, Fl), lambda b: (0, b)),            # z_l (aliased -> y_l)
        pl.BlockSpec((cohp, 1), lambda b: (0, 0)),             # scale_h
        pl.BlockSpec((cohp, 1), lambda b: (0, 0)),             # shift_h
        pl.BlockSpec((colp, 1), lambda b: (0, 0)),             # scale_l
        pl.BlockSpec((colp, 1), lambda b: (0, 0)),             # shift_l
        pl.BlockSpec((1, Fh), lambda b: (0, b)),               # mask_h
        pl.BlockSpec((1, Fl), lambda b: (0, b)),               # mask_l
        smem,                                                  # prelu alpha
    ]
    args = [z_h_c, z_l_c, scale_h, shift_h, scale_l, shift_l, mask_h, mask_l, alpha]
    if with_res:
        rh_c, rl_c = residual
        in_specs += [pl.BlockSpec((cohp, Fh), lambda b: (0, b)),
                     pl.BlockSpec((colp, Fl), lambda b: (0, b))]
        args += [rh_c, rl_c]
    io_alias = {0: 0, 1: 1}  # reuse conv-output HBM buffers for the normalized outputs

    cost_c = pl.CostEstimate(
        flops=(5 + int(with_res)) * (PH * cohp + PL * colp),
        transcendentals=0,
        bytes_accessed=4 * (2 + int(with_res)) * (PH * cohp + PL * colp))
    y_h_c, y_l_c = pl.pallas_call(
        functools.partial(_bn_act_kernel, with_res),
        grid=(n_blocks,),
        in_specs=in_specs,
        out_specs=(pl.BlockSpec((cohp, Fh), lambda b: (0, b)),
                   pl.BlockSpec((colp, Fl), lambda b: (0, b))),
        out_shape=(jax.ShapeDtypeStruct((cohp, PH), jnp.float32),
                   jax.ShapeDtypeStruct((colp, PL), jnp.float32)),
        compiler_params=cparams,
        cost_estimate=cost_c,
        input_output_aliases=io_alias,
    )(*args)
    return y_h_c, y_l_c


def res_block_pallas(p1, p2, x_h, x_l):
    """ResBlock forward: two Conv_BN_ACT layers, then residual add. NHWC in/out."""
    N, H, W, cih = x_h.shape
    cil = x_l.shape[-1]
    coh1, col1 = p1["w_h2h"].shape[-1], p1["w_l2l"].shape[-1]
    coh2, col2 = p2["w_h2h"].shape[-1], p2["w_l2l"].shape[-1]

    xh_c = nhwc_to_cpad(x_h, _ceil_to(cih, SUB))
    xl_c = nhwc_to_cpad(x_l, _ceil_to(cil, SUB))

    h_c, l_c = conv_bn_act_pallas(p1, xh_c, xl_c, (N, H, W, cih, cil, coh1, col1))
    h_c, l_c = conv_bn_act_pallas(p2, h_c, l_c, (N, H, W, coh1, col1, coh2, col2),
                                  residual=(xh_c, xl_c))  # residual add fused in-kernel

    y_h = cpad_to_nhwc(h_c, N, H, W, coh2)
    y_l = cpad_to_nhwc(l_c, N, H // 2, W // 2, col2)
    return y_h, y_l


# ---------------------------------------------------------------------------
# Deterministic parameter init (synthetic; shapes follow the module __init__).
# ---------------------------------------------------------------------------
def init_conv_bn_act(key, cih, cil, coh, col):
    ks = jax.random.split(key, 8)
    s = 0.1
    return dict(
        w_h2h=s * jax.random.normal(ks[0], (3, 3, cih, coh), jnp.float32),
        w_l2h=s * jax.random.normal(ks[1], (3, 3, cil, coh), jnp.float32),
        w_h2l=s * jax.random.normal(ks[2], (3, 3, cih, col), jnp.float32),
        w_l2l=s * jax.random.normal(ks[3], (3, 3, cil, col), jnp.float32),
        gamma_h=1.0 + 0.1 * jax.random.normal(ks[4], (coh,), jnp.float32),
        beta_h=0.1 * jax.random.normal(ks[5], (coh,), jnp.float32),
        gamma_l=1.0 + 0.1 * jax.random.normal(ks[6], (col,), jnp.float32),
        beta_l=0.1 * jax.random.normal(ks[7], (col,), jnp.float32),
        prelu_alpha=jnp.full((1,), 0.25, jnp.float32),  # nn.PReLU() default
    )


# ---------------------------------------------------------------------------
# Pure-JAX reference (for cross-checking the kernels).
# ---------------------------------------------------------------------------
def _avgpool2_nhwc(x):
    N, H, W, C = x.shape
    return x.reshape(N, H // 2, 2, W // 2, 2, C).mean(axis=(2, 4))


def _upsample2_nhwc(x):
    return jnp.repeat(jnp.repeat(x, 2, axis=1), 2, axis=2)


def _ref_conv3x3(x, w):
    return jax.lax.conv_general_dilated(
        x, w, window_strides=(1, 1), padding=((1, 1), (1, 1)),
        dimension_numbers=("NHWC", "HWIO", "NHWC"))


def _ref_bn_train(x, gamma, beta, eps=EPS):
    mu = x.mean(axis=(0, 1, 2))
    var = ((x - mu) ** 2).mean(axis=(0, 1, 2))
    return (x - mu) / jnp.sqrt(var + eps) * gamma + beta


def _ref_layer(p, x_h, x_l):
    a = p["prelu_alpha"][0]
    h2h = _ref_conv3x3(x_h, p["w_h2h"])
    l2h = _upsample2_nhwc(_ref_conv3x3(x_l, p["w_l2h"]))
    h2l = _ref_conv3x3(_avgpool2_nhwc(x_h), p["w_h2l"])
    l2l = _ref_conv3x3(x_l, p["w_l2l"])
    y_h = _ref_bn_train(l2h + h2h, p["gamma_h"], p["beta_h"])
    y_l = _ref_bn_train(h2l + l2l, p["gamma_l"], p["beta_l"])
    y_h = jnp.where(y_h > 0, y_h, a * y_h)
    y_l = jnp.where(y_l > 0, y_l, a * y_l)
    return y_h, y_l


def _ref_resblock(p1, p2, x_h, x_l):
    h, l = _ref_layer(p1, x_h, x_l)
    h, l = _ref_layer(p2, h, l)
    return h + x_h, l + x_l


if __name__ == "__main__":
    key = jax.random.PRNGKey(0)
    k_xh, k_xl, k_p1, k_p2 = jax.random.split(key, 4)

    # ResBlock(in_channels=8, out_channels=8, alpha=0.5): 4 high-freq + 4 low-freq
    # channels, low branch at half spatial resolution.
    N, C, H, W = 2, 8, 16, 16
    c_hi = C - int(0.5 * C)   # 4
    c_lo = int(0.5 * C)       # 4

    x_h = jax.random.normal(k_xh, (N, H, W, c_hi), jnp.float32)            # torch (2,4,16,16)
    x_l = jax.random.normal(k_xl, (N, H // 2, W // 2, c_lo), jnp.float32)  # torch (2,4,8,8)

    p1 = init_conv_bn_act(k_p1, c_hi, c_lo, c_hi, c_lo)
    p2 = init_conv_bn_act(k_p2, c_hi, c_lo, c_hi, c_lo)

    y_h, y_l = jax.jit(res_block_pallas)(p1, p2, x_h, x_l)
    jax.block_until_ready((y_h, y_l))

    # Cross-check against the pure-JAX/XLA reference.
    r_h, r_l = _ref_resblock(p1, p2, x_h, x_l)
    assert y_h.shape == x_h.shape and y_l.shape == x_l.shape
    assert jnp.allclose(y_h, r_h, atol=2e-2, rtol=2e-2), float(jnp.max(jnp.abs(y_h - r_h)))
    assert jnp.allclose(y_l, r_l, atol=2e-2, rtol=2e-2), float(jnp.max(jnp.abs(y_l - r_l)))

    print("KERNEL_OK")
</pallas_src>

<mosaic_0001>
module attributes {stable_mosaic.version = 11 : i64} {
  func.func @_low_kernel(%arg0: i32, %arg1: memref<8x128xf32, #tpu.memory_space<vmem>>, %arg2: memref<8x128xf32, #tpu.memory_space<vmem>>, %arg3: memref<8x72xbf16, #tpu.memory_space<vmem>>, %arg4: memref<8x144xbf16, #tpu.memory_space<vmem>>, %arg5: memref<1x128xf32, #tpu.memory_space<vmem>>, %arg6: memref<8x128xf32, #tpu.memory_space<vmem>>, %arg7: memref<8x128xf32, #tpu.memory_space<vmem>>, %arg8: memref<1x8x2xf32, #tpu.memory_space<vmem>>) attributes {dimension_semantics = [#tpu.dimension_semantics<parallel>], iteration_bounds = array<i64: 2>, scalar_prefetch = 0 : i64, scratch_operands = 0 : i64, tpu.core_type = #tpu.core_type<tc>, window_params = [{transform_indices = @transform_0, window_bounds = array<i64: 8, 128>}, {transform_indices = @transform_1, window_bounds = array<i64: 8, 128>}, {pipeline_mode = #tpu.pipeline_mode<synchronous>, transform_indices = @transform_2, window_bounds = array<i64: 8, 72>}, {pipeline_mode = #tpu.pipeline_mode<synchronous>, transform_indices = @transform_3, window_bounds = array<i64: 8, 144>}, {transform_indices = @transform_4, window_bounds = array<i64: 1, 128>}, {transform_indices = @transform_5, window_bounds = array<i64: 8, 128>}, {transform_indices = @transform_6, window_bounds = array<i64: 8, 128>}, {transform_indices = @transform_7, window_bounds = array<i64: 1, 8, 2>}]} {
    %c0 = arith.constant 0 : index
    %c0_0 = arith.constant 0 : index
    %0 = vector.load %arg1[%c0, %c0_0] : memref<8x128xf32, #tpu.memory_space<vmem>>, vector<8x128xf32>
    %1 = tpu.concatenate %0, %0 in 1 : vector<8x128xf32>, vector<8x128xf32> -> vector<8x256xf32>
    %2 = vector.extract_strided_slice %1 {offsets = [0, 117], sizes = [8, 128], strides = [1, 1]} : vector<8x256xf32> to vector<8x128xf32>
    %3 = vector.extract_strided_slice %1 {offsets = [0, 118], sizes = [8, 128], strides = [1, 1]} : vector<8x256xf32> to vector<8x128xf32>
    %4 = vector.extract_strided_slice %1 {offsets = [0, 119], sizes = [8, 128], strides = [1, 1]} : vector<8x256xf32> to vector<8x128xf32>
    %5 = vector.extract_strided_slice %1 {offsets = [0, 127], sizes = [8, 128], strides = [1, 1]} : vector<8x256xf32> to vector<8x128xf32>
    %6 = vector.extract_strided_slice %1 {offsets = [0, 0], sizes = [8, 128], strides = [1, 1]} : vector<8x256xf32> to vector<8x128xf32>
    %7 = vector.extract_strided_slice %1 {offsets = [0, 1], sizes = [8, 128], strides = [1, 1]} : vector<8x256xf32> to vector<8x128xf32>
    %8 = vector.extract_strided_slice %1 {offsets = [0, 9], sizes = [8, 128], strides = [1, 1]} : vector<8x256xf32> to vector<8x128xf32>
    %9 = vector.extract_strided_slice %1 {offsets = [0, 10], sizes = [8, 128], strides = [1, 1]} : vector<8x256xf32> to vector<8x128xf32>
    %10 = vector.extract_strided_slice %1 {offsets = [0, 11], sizes = [8, 128], strides = [1, 1]} : vector<8x256xf32> to vector<8x128xf32>
    %11 = tpu.concatenate %2, %3, %4, %5, %6, %7, %8, %9, %10 in 0 : vector<8x128xf32>, vector<8x128xf32>, vector<8x128xf32>, vector<8x128xf32>, vector<8x128xf32>, vector<8x128xf32>, vector<8x128xf32>, vector<8x128xf32>, vector<8x128xf32> -> vector<72x128xf32>
    %c0_1 = arith.constant 0 : index
    %c0_2 = arith.constant 0 : index
    %12 = vector.load %arg2[%c0_1, %c0_2] : memref<8x128xf32, #tpu.memory_space<vmem>>, vector<8x128xf32>
    %13 = tpu.concatenate %12, %12 in 1 : vector<8x128xf32>, vector<8x128xf32> -> vector<8x256xf32>
    %14 = vector.extract_strided_slice %13 {offsets = [0, 117], sizes = [8, 128], strides = [1, 1]} : vector<8x256xf32> to vector<8x128xf32>
    %15 = vector.extract_strided_slice %13 {offsets = [0, 118], sizes = [8, 128], strides = [1, 1]} : vector<8x256xf32> to vector<8x128xf32>
    %16 = vector.extract_strided_slice %13 {offsets = [0, 119], sizes = [8, 128], strides = [1, 1]} : vector<8x256xf32> to vector<8x128xf32>
    %17 = vector.extract_strided_slice %13 {offsets = [0, 127], sizes = [8, 128], strides = [1, 1]} : vector<8x256xf32> to vector<8x128xf32>
    %18 = vector.extract_strided_slice %13 {offsets = [0, 0], sizes = [8, 128], strides = [1, 1]} : vector<8x256xf32> to vector<8x128xf32>
    %19 = vector.extract_strided_slice %13 {offsets = [0, 1], sizes = [8, 128], strides = [1, 1]} : vector<8x256xf32> to vector<8x128xf32>
    %20 = vector.extract_strided_slice %13 {offsets = [0, 9], sizes = [8, 128], strides = [1, 1]} : vector<8x256xf32> to vector<8x128xf32>
    %21 = vector.extract_strided_slice %13 {offsets = [0, 10], sizes = [8, 128], strides = [1, 1]} : vector<8x256xf32> to vector<8x128xf32>
    %22 = vector.extract_strided_slice %13 {offsets = [0, 11], sizes = [8, 128], strides = [1, 1]} : vector<8x256xf32> to vector<8x128xf32>
    %23 = tpu.concatenate %14, %15, %16, %17, %18, %19, %20, %21, %22 in 0 : vector<8x128xf32>, vector<8x128xf32>, vector<8x128xf32>, vector<8x128xf32>, vector<8x128xf32>, vector<8x128xf32>, vector<8x128xf32>, vector<8x128xf32>, vector<8x128xf32> -> vector<72x128xf32>
    %c0_3 = arith.constant 0 : index
    %c0_4 = arith.constant 0 : index
    %24 = vector.load %arg3[%c0_3, %c0_4] : memref<8x72xbf16, #tpu.memory_space<vmem>>, vector<8x72xbf16>
    %25 = arith.truncf %11 : vector<72x128xf32> to vector<72x128xbf16>
    %cst = arith.constant dense<0.000000e+00> : vector<8x128xf32>
    %26 = tpu.matmul %24, %25, %cst {dimension_numbers = #tpu.dot_dimension_numbers<[1], [0], [0], [1], [0, 0, 1, 1], [], []>} : vector<8x72xbf16>, vector<72x128xbf16>, vector<8x128xf32> -> vector<8x128xf32>
    %c0_5 = arith.constant 0 : index
    %c0_6 = arith.constant 0 : index
    %27 = vector.load %arg6[%c0_5, %c0_6] : memref<8x128xf32, #tpu.memory_space<vmem>>, vector<8x128xf32>
    tpu.vector_store %arg6[%c0_5, %c0_6], %26 {strides = array<i32>} : memref<8x128xf32, #tpu.memory_space<vmem>>, vector<8x128xf32>,
    %28 = tpu.concatenate %23, %11 in 0 : vector<72x128xf32>, vector<72x128xf32> -> vector<144x128xf32>
    %29 = arith.truncf %28 : vector<144x128xf32> to vector<144x128xbf16>
    %c0_7 = arith.constant 0 : index
    %c0_8 = arith.constant 0 : index
    %30 = vector.load %arg4[%c0_7, %c0_8] : memref<8x144xbf16, #tpu.memory_space<vmem>>, vector<8x144xbf16>
    %cst_9 = arith.constant dense<0.000000e+00> : vector<8x128xf32>
    %31 = tpu.matmul %30, %29, %cst_9 {dimension_numbers = #tpu.dot_dimension_numbers<[1], [0], [0], [1], [0, 0, 1, 1], [], []>} : vector<8x144xbf16>, vector<144x128xbf16>, vector<8x128xf32> -> vector<8x128xf32>
    %c0_10 = arith.constant 0 : index
    %c0_11 = arith.constant 0 : index
    %32 = vector.load %arg7[%c0_10, %c0_11] : memref<8x128xf32, #tpu.memory_space<vmem>>, vector<8x128xf32>
    tpu.vector_store %arg7[%c0_10, %c0_11], %31 {strides = array<i32>} : memref<8x128xf32, #tpu.memory_space<vmem>>, vector<8x128xf32>,
    %c0_12 = arith.constant 0 : index
    %c0_13 = arith.constant 0 : index
    %33 = vector.load %arg5[%c0_12, %c0_13] : memref<1x128xf32, #tpu.memory_space<vmem>>, vector<1x128xf32>
    %34 = vector.broadcast %33 : vector<1x128xf32> to vector<8x128xf32>
    %35 = arith.mulf %31, %34 : vector<8x128xf32>
    %cst_14 = arith.constant dense<0.000000e+00> : vector<8xf32>
    %36 = vector.multi_reduction <add>, %35, %cst_14 [1] : vector<8x128xf32> to vector<8xf32>
    %37 = vector.shape_cast %36 : vector<8xf32> to vector<8x1xf32>
    %38 = arith.mulf %35, %31 : vector<8x128xf32>
    %cst_15 = arith.constant dense<0.000000e+00> : vector<8xf32>
    %39 = vector.multi_reduction <add>, %38, %cst_15 [1] : vector<8x128xf32> to vector<8xf32>
    %40 = vector.shape_cast %39 : vector<8xf32> to vector<8x1xf32>
    %41 = tpu.concatenate %37, %40 in 1 : vector<8x1xf32>, vector<8x1xf32> -> vector<8x2xf32>
    %42 = vector.shape_cast %41 : vector<8x2xf32> to vector<1x8x2xf32>
    %c0_16 = arith.constant 0 : index
    %c0_17 = arith.constant 0 : index
    %c0_18 = arith.constant 0 : index
    %43 = vector.load %arg8[%c0_16, %c0_17, %c0_18] : memref<1x8x2xf32, #tpu.memory_space<vmem>>, vector<1x8x2xf32>
    tpu.vector_store %arg8[%c0_16, %c0_17, %c0_18], %42 {strides = array<i32>} : memref<1x8x2xf32, #tpu.memory_space<vmem>>, vector<1x8x2xf32>,
    return
  }
  func.func @transform_0(%arg0: i32) -> (i32, i32) {
    %c0_i32 = arith.constant 0 : i32
    %c0_i32_0 = arith.constant 0 : i32
    return %c0_i32, %arg0 : i32, i32
  }
  func.func @transform_1(%arg0: i32) -> (i32, i32) {
    %c0_i32 = arith.constant 0 : i32
    %c0_i32_0 = arith.constant 0 : i32
    return %c0_i32, %arg0 : i32, i32
  }
  func.func @transform_2(%arg0: i32) -> (i32, i32) {
    %c0_i32 = arith.constant 0 : i32
    %c0_i32_0 = arith.constant 0 : i32
    %c0_i32_1 = arith.constant 0 : i32
    return %c0_i32, %c0_i32_0 : i32, i32
  }
  func.func @transform_3(%arg0: i32) -> (i32, i32) {
    %c0_i32 = arith.constant 0 : i32
    %c0_i32_0 = arith.constant 0 : i32
    %c0_i32_1 = arith.constant 0 : i32
    return %c0_i32, %c0_i32_0 : i32, i32
  }
  func.func @transform_4(%arg0: i32) -> (i32, i32) {
    %c0_i32 = arith.constant 0 : i32
    %c0_i32_0 = arith.constant 0 : i32
    return %c0_i32, %arg0 : i32, i32
  }
  func.func @transform_5(%arg0: i32) -> (i32, i32) {
    %c0_i32 = arith.constant 0 : i32
    %c0_i32_0 = arith.constant 0 : i32
    return %c0_i32, %arg0 : i32, i32
  }
  func.func @transform_6(%arg0: i32) -> (i32, i32) {
    %c0_i32 = arith.constant 0 : i32
    %c0_i32_0 = arith.constant 0 : i32
    return %c0_i32, %arg0 : i32, i32
  }
  func.func @transform_7(%arg0: i32) -> (i32, i32, i32) {
    %c0_i32 = arith.constant 0 : i32
    %c0_i32_0 = arith.constant 0 : i32
    %c0_i32_1 = arith.constant 0 : i32
    return %arg0, %c0_i32, %c0_i32_0 : i32, i32, i32
  }
}

module attributes {stable_mosaic.version = 11 : i64} {
  func.func @_high_kernel(%arg0: i32, %arg1: memref<8x384xf32, #tpu.memory_space<vmem>>, %arg2: memref<8x384xf32, #tpu.memory_space<vmem>>, %arg3: memref<8x72xbf16, #tpu.memory_space<vmem>>, %arg4: memref<1x384xf32, #tpu.memory_space<vmem>>, %arg5: memref<8x384xf32, #tpu.memory_space<vmem>>, %arg6: memref<1x8x2xf32, #tpu.memory_space<vmem>>) attributes {dimension_semantics = [#tpu.dimension_semantics<parallel>], iteration_bounds = array<i64: 2>, scalar_prefetch = 0 : i64, scratch_operands = 0 : i64, tpu.core_type = #tpu.core_type<tc>, window_params = [{transform_indices = @transform_0, window_bounds = array<i64: 8, 384>}, {transform_indices = @transform_1, window_bounds = array<i64: 8, 384>}, {pipeline_mode = #tpu.pipeline_mode<synchronous>, transform_indices = @transform_2, window_bounds = array<i64: 8, 72>}, {transform_indices = @transform_3, window_bounds = array<i64: 1, 384>}, {transform_indices = @transform_4, window_bounds = array<i64: 8, 384>}, {transform_indices = @transform_5, window_bounds = array<i64: 1, 8, 2>}]} {
    %c0 = arith.constant 0 : index
    %c0_0 = arith.constant 0 : index
    %0 = vector.load %arg1[%c0, %c0_0] : memref<8x384xf32, #tpu.memory_space<vmem>>, vector<8x384xf32>
    %1 = tpu.concatenate %0, %0 in 1 : vector<8x384xf32>, vector<8x384xf32> -> vector<8x768xf32>
    %2 = vector.extract_strided_slice %1 {offsets = [0, 365], sizes = [8, 384], strides = [1, 1]} : vector<8x768xf32> to vector<8x384xf32>
    %3 = vector.extract_strided_slice %1 {offsets = [0, 366], sizes = [8, 384], strides = [1, 1]} : vector<8x768xf32> to vector<8x384xf32>
    %4 = vector.extract_strided_slice %1 {offsets = [0, 367], sizes = [8, 384], strides = [1, 1]} : vector<8x768xf32> to vector<8x384xf32>
    %5 = vector.extract_strided_slice %1 {offsets = [0, 383], sizes = [8, 384], strides = [1, 1]} : vector<8x768xf32> to vector<8x384xf32>
    %6 = vector.extract_strided_slice %1 {offsets = [0, 0], sizes = [8, 384], strides = [1, 1]} : vector<8x768xf32> to vector<8x384xf32>
    %7 = vector.extract_strided_slice %1 {offsets = [0, 1], sizes = [8, 384], strides = [1, 1]} : vector<8x768xf32> to vector<8x384xf32>
    %8 = vector.extract_strided_slice %1 {offsets = [0, 17], sizes = [8, 384], strides = [1, 1]} : vector<8x768xf32> to vector<8x384xf32>
    %9 = vector.extract_strided_slice %1 {offsets = [0, 18], sizes = [8, 384], strides = [1, 1]} : vector<8x768xf32> to vector<8x384xf32>
    %10 = vector.extract_strided_slice %1 {offsets = [0, 19], sizes = [8, 384], strides = [1, 1]} : vector<8x768xf32> to vector<8x384xf32>
    %11 = tpu.concatenate %2, %3, %4, %5, %6, %7, %8, %9, %10 in 0 : vector<8x384xf32>, vector<8x384xf32>, vector<8x384xf32>, vector<8x384xf32>, vector<8x384xf32>, vector<8x384xf32>, vector<8x384xf32>, vector<8x384xf32>, vector<8x384xf32> -> vector<72x384xf32>
    %12 = arith.truncf %11 : vector<72x384xf32> to vector<72x384xbf16>
    %c0_1 = arith.constant 0 : index
    %c0_2 = arith.constant 0 : index
    %13 = vector.load %arg3[%c0_1, %c0_2] : memref<8x72xbf16, #tpu.memory_space<vmem>>, vector<8x72xbf16>
    %cst = arith.constant dense<0.000000e+00> : vector<8x384xf32>
    %14 = tpu.matmul %13, %12, %cst {dimension_numbers = #tpu.dot_dimension_numbers<[1], [0], [0], [1], [0, 0, 1, 1], [], []>} : vector<8x72xbf16>, vector<72x384xbf16>, vector<8x384xf32> -> vector<8x384xf32>
    %c0_3 = arith.constant 0 : index
    %c0_4 = arith.constant 0 : index
    %15 = vector.load %arg2[%c0_3, %c0_4] : memref<8x384xf32, #tpu.memory_space<vmem>>, vector<8x384xf32>
    %16 = arith.addf %14, %15 : vector<8x384xf32>
    %c0_5 = arith.constant 0 : index
    %c0_6 = arith.constant 0 : index
    %17 = vector.load %arg5[%c0_5, %c0_6] : memref<8x384xf32, #tpu.memory_space<vmem>>, vector<8x384xf32>
    tpu.vector_store %arg5[%c0_5, %c0_6], %16 {strides = array<i32>} : memref<8x384xf32, #tpu.memory_space<vmem>>, vector<8x384xf32>,
    %c0_7 = arith.constant 0 : index
    %c0_8 = arith.constant 0 : index
    %18 = vector.load %arg4[%c0_7, %c0_8] : memref<1x384xf32, #tpu.memory_space<vmem>>, vector<1x384xf32>
    %19 = vector.broadcast %18 : vector<1x384xf32> to vector<8x384xf32>
    %20 = arith.mulf %16, %19 : vector<8x384xf32>
    %cst_9 = arith.constant dense<0.000000e+00> : vector<8xf32>
    %21 = vector.multi_reduction <add>, %20, %cst_9 [1] : vector<8x384xf32> to vector<8xf32>
    %22 = vector.shape_cast %21 : vector<8xf32> to vector<8x1xf32>
    %23 = arith.mulf %20, %16 : vector<8x384xf32>
    %cst_10 = arith.constant dense<0.000000e+00> : vector<8xf32>
    %24 = vector.multi_reduction <add>, %23, %cst_10 [1] : vector<8x384xf32> to vector<8xf32>
    %25 = vector.shape_cast %24 : vector<8xf32> to vector<8x1xf32>
    %26 = tpu.concatenate %22, %25 in 1 : vector<8x1xf32>, vector<8x1xf32> -> vector<8x2xf32>
    %27 = vector.shape_cast %26 : vector<8x2xf32> to vector<1x8x2xf32>
    %c0_11 = arith.constant 0 : index
    %c0_12 = arith.constant 0 : index
    %c0_13 = arith.constant 0 : index
    %28 = vector.load %arg6[%c0_11, %c0_12, %c0_13] : memref<1x8x2xf32, #tpu.memory_space<vmem>>, vector<1x8x2xf32>
    tpu.vector_store %arg6[%c0_11, %c0_12, %c0_13], %27 {strides = array<i32>} : memref<1x8x2xf32, #tpu.memory_space<vmem>>, vector<1x8x2xf32>,
    return
  }
  func.func @transform_0(%arg0: i32) -> (i32, i32) {
    %c0_i32 = arith.constant 0 : i32
    %c0_i32_0 = arith.constant 0 : i32
    return %c0_i32, %arg0 : i32, i32
  }
  func.func @transform_1(%arg0: i32) -> (i32, i32) {
    %c0_i32 = arith.constant 0 : i32
    %c0_i32_0 = arith.constant 0 : i32
    return %c0_i32, %arg0 : i32, i32
  }
  func.func @transform_2(%arg0: i32) -> (i32, i32) {
    %c0_i32 = arith.constant 0 : i32
    %c0_i32_0 = arith.constant 0 : i32
    %c0_i32_1 = arith.constant 0 : i32
    return %c0_i32, %c0_i32_0 : i32, i32
  }
  func.func @transform_3(%arg0: i32) -> (i32, i32) {
    %c0_i32 = arith.constant 0 : i32
    %c0_i32_0 = arith.constant 0 : i32
    return %c0_i32, %arg0 : i32, i32
  }
  func.func @transform_4(%arg0: i32) -> (i32, i32) {
    %c0_i32 = arith.constant 0 : i32
    %c0_i32_0 = arith.constant 0 : i32
    return %c0_i32, %arg0 : i32, i32
  }
  func.func @transform_5(%arg0: i32) -> (i32, i32, i32) {
    %c0_i32 = arith.constant 0 : i32
    %c0_i32_0 = arith.constant 0 : i32
    %c0_i32_1 = arith.constant 0 : i32
    return %arg0, %c0_i32, %c0_i32_0 : i32, i32, i32
  }
}

module attributes {stable_mosaic.version = 11 : i64} {
  func.func @_bn_act_kernel(%arg0: i32, %arg1: memref<8x384xf32, #tpu.memory_space<vmem>>, %arg2: memref<8x128xf32, #tpu.memory_space<vmem>>, %arg3: memref<8x1xf32, #tpu.memory_space<vmem>>, %arg4: memref<8x1xf32, #tpu.memory_space<vmem>>, %arg5: memref<8x1xf32, #tpu.memory_space<vmem>>, %arg6: memref<8x1xf32, #tpu.memory_space<vmem>>, %arg7: memref<1x384xf32, #tpu.memory_space<vmem>>, %arg8: memref<1x128xf32, #tpu.memory_space<vmem>>, %arg9: memref<1xf32, #tpu.memory_space<smem>>, %arg10: memref<8x384xf32, #tpu.memory_space<vmem>>, %arg11: memref<8x128xf32, #tpu.memory_space<vmem>>) attributes {dimension_semantics = [#tpu.dimension_semantics<parallel>], iteration_bounds = array<i64: 2>, scalar_prefetch = 0 : i64, scratch_operands = 0 : i64, tpu.core_type = #tpu.core_type<tc>, window_params = [{transform_indices = @transform_0, window_bounds = array<i64: 8, 384>}, {transform_indices = @transform_1, window_bounds = array<i64: 8, 128>}, {pipeline_mode = #tpu.pipeline_mode<synchronous>, transform_indices = @transform_2, window_bounds = array<i64: 8, 1>}, {pipeline_mode = #tpu.pipeline_mode<synchronous>, transform_indices = @transform_3, window_bounds = array<i64: 8, 1>}, {pipeline_mode = #tpu.pipeline_mode<synchronous>, transform_indices = @transform_4, window_bounds = array<i64: 8, 1>}, {pipeline_mode = #tpu.pipeline_mode<synchronous>, transform_indices = @transform_5, window_bounds = array<i64: 8, 1>}, {transform_indices = @transform_6, window_bounds = array<i64: 1, 384>}, {transform_indices = @transform_7, window_bounds = array<i64: 1, 128>}, {transform_indices = @transform_8, window_bounds = array<i64: 1>}, {transform_indices = @transform_9, window_bounds = array<i64: 8, 384>}, {transform_indices = @transform_10, window_bounds = array<i64: 8, 128>}]} {
    %c0 = arith.constant 0 : index
    %0 = memref.load %arg9[%c0] : memref<1xf32, #tpu.memory_space<smem>>
    %c0_0 = arith.constant 0 : index
    %c0_1 = arith.constant 0 : index
    %1 = vector.load %arg1[%c0_0, %c0_1] : memref<8x384xf32, #tpu.memory_space<vmem>>, vector<8x384xf32>
    %c0_2 = arith.constant 0 : index
    %c0_3 = arith.constant 0 : index
    %2 = vector.load %arg3[%c0_2, %c0_3] : memref<8x1xf32, #tpu.memory_space<vmem>>, vector<8x1xf32>
    %3 = vector.broadcast %2 : vector<8x1xf32> to vector<8x384xf32>
    %4 = arith.mulf %1, %3 : vector<8x384xf32>
    %c0_4 = arith.constant 0 : index
    %c0_5 = arith.constant 0 : index
    %5 = vector.load %arg4[%c0_4, %c0_5] : memref<8x1xf32, #tpu.memory_space<vmem>>, vector<8x1xf32>
    %6 = vector.broadcast %5 : vector<8x1xf32> to vector<8x384xf32>
    %7 = arith.addf %4, %6 : vector<8x384xf32>
    %cst = arith.constant 0.000000e+00 : f32
    %8 = vector.broadcast %cst : f32 to vector<8x384xf32>
    %9 = arith.cmpf ogt, %7, %8 : vector<8x384xf32>
    %10 = vector.broadcast %0 : f32 to vector<8x384xf32>
    %11 = arith.mulf %10, %7 : vector<8x384xf32>
    %12 = arith.select %9, %7, %11 : vector<8x384xi1>, vector<8x384xf32>
    %c0_6 = arith.constant 0 : index
    %c0_7 = arith.constant 0 : index
    %13 = vector.load %arg7[%c0_6, %c0_7] : memref<1x384xf32, #tpu.memory_space<vmem>>, vector<1x384xf32>
    %14 = vector.broadcast %13 : vector<1x384xf32> to vector<8x384xf32>
    %15 = arith.mulf %12, %14 : vector<8x384xf32>
    %c0_8 = arith.constant 0 : index
    %c0_9 = arith.constant 0 : index
    %16 = vector.load %arg10[%c0_8, %c0_9] : memref<8x384xf32, #tpu.memory_space<vmem>>, vector<8x384xf32>
    tpu.vector_store %arg10[%c0_8, %c0_9], %15 {strides = array<i32>} : memref<8x384xf32, #tpu.memory_space<vmem>>, vector<8x384xf32>,
    %c0_10 = arith.constant 0 : index
    %c0_11 = arith.constant 0 : index
    %17 = vector.load %arg2[%c0_10, %c0_11] : memref<8x128xf32, #tpu.memory_space<vmem>>, vector<8x128xf32>
    %c0_12 = arith.constant 0 : index
    %c0_13 = arith.constant 0 : index
    %18 = vector.load %arg5[%c0_12, %c0_13] : memref<8x1xf32, #tpu.memory_space<vmem>>, vector<8x1xf32>
    %19 = vector.broadcast %18 : vector<8x1xf32> to vector<8x128xf32>
    %20 = arith.mulf %17, %19 : vector<8x128xf32>
    %c0_14 = arith.constant 0 : index
    %c0_15 = arith.constant 0 : index
    %21 = vector.load %arg6[%c0_14, %c0_15] : memref<8x1xf32, #tpu.memory_space<vmem>>, vector<8x1xf32>
    %22 = vector.broadcast %21 : vector<8x1xf32> to vector<8x128xf32>
    %23 = arith.addf %20, %22 : vector<8x128xf32>
    %cst_16 = arith.constant 0.000000e+00 : f32
    %24 = vector.broadcast %cst_16 : f32 to vector<8x128xf32>
    %25 = arith.cmpf ogt, %23, %24 : vector<8x128xf32>
    %26 = vector.broadcast %0 : f32 to vector<8x128xf32>
    %27 = arith.mulf %26, %23 : vector<8x128xf32>
    %28 = arith.select %25, %23, %27 : vector<8x128xi1>, vector<8x128xf32>
    %c0_17 = arith.constant 0 : index
    %c0_18 = arith.constant 0 : index
    %29 = vector.load %arg8[%c0_17, %c0_18] : memref<1x128xf32, #tpu.memory_space<vmem>>, vector<1x128xf32>
    %30 = vector.broadcast %29 : vector<1x128xf32> to vector<8x128xf32>
    %31 = arith.mulf %28, %30 : vector<8x128xf32>
    %c0_19 = arith.constant 0 : index
    %c0_20 = arith.constant 0 : index
    %32 = vector.load %arg11[%c0_19, %c0_20] : memref<8x128xf32, #tpu.memory_space<vmem>>, vector<8x128xf32>
    tpu.vector_store %arg11[%c0_19, %c0_20], %31 {strides = array<i32>} : memref<8x128xf32, #tpu.memory_space<vmem>>, vector<8x128xf32>,
    return
  }
  func.func @transform_0(%arg0: i32) -> (i32, i32) {
    %c0_i32 = arith.constant 0 : i32
    %c0_i32_0 = arith.constant 0 : i32
    return %c0_i32, %arg0 : i32, i32
  }
  func.func @transform_1(%arg0: i32) -> (i32, i32) {
    %c0_i32 = arith.constant 0 : i32
    %c0_i32_0 = arith.constant 0 : i32
    return %c0_i32, %arg0 : i32, i32
  }
  func.func @transform_2(%arg0: i32) -> (i32, i32) {
    %c0_i32 = arith.constant 0 : i32
    %c0_i32_0 = arith.constant 0 : i32
    %c0_i32_1 = arith.constant 0 : i32
    return %c0_i32, %c0_i32_0 : i32, i32
  }
  func.func @transform_3(%arg0: i32) -> (i32, i32) {
    %c0_i32 = arith.constant 0 : i32
    %c0_i32_0 = arith.constant 0 : i32
    %c0_i32_1 = arith.constant 0 : i32
    return %c0_i32, %c0_i32_0 : i32, i32
  }
  func.func @transform_4(%arg0: i32) -> (i32, i32) {
    %c0_i32 = arith.constant 0 : i32
    %c0_i32_0 = arith.constant 0 : i32
    %c0_i32_1 = arith.constant 0 : i32
    return %c0_i32, %c0_i32_0 : i32, i32
  }
  func.func @transform_5(%arg0: i32) -> (i32, i32) {
    %c0_i32 = arith.constant 0 : i32
    %c0_i32_0 = arith.constant 0 : i32
    %c0_i32_1 = arith.constant 0 : i32
    return %c0_i32, %c0_i32_0 : i32, i32
  }
  func.func @transform_6(%arg0: i32) -> (i32, i32) {
    %c0_i32 = arith.constant 0 : i32
    %c0_i32_0 = arith.constant 0 : i32
    return %c0_i32, %arg0 : i32, i32
  }
  func.func @transform_7(%arg0: i32) -> (i32, i32) {
    %c0_i32 = arith.constant 0 : i32
    %c0_i32_0 = arith.constant 0 : i32
    return %c0_i32, %arg0 : i32, i32
  }
  func.func @transform_8(%arg0: i32) -> i32 {
    %c0_i32 = arith.constant 0 : i32
    %c0_i32_0 = arith.constant 0 : i32
    return %c0_i32 : i32
  }
  func.func @transform_9(%arg0: i32) -> (i32, i32) {
    %c0_i32 = arith.constant 0 : i32
    %c0_i32_0 = arith.constant 0 : i32
    return %c0_i32, %arg0 : i32, i32
  }
  func.func @transform_10(%arg0: i32) -> (i32, i32) {
    %c0_i32 = arith.constant 0 : i32
    %c0_i32_0 = arith.constant 0 : i32
    return %c0_i32, %arg0 : i32, i32
  }
}

module attributes {stable_mosaic.version = 11 : i64} {
  func.func @_bn_act_kernel(%arg0: i32, %arg1: memref<8x384xf32, #tpu.memory_space<vmem>>, %arg2: memref<8x128xf32, #tpu.memory_space<vmem>>, %arg3: memref<8x1xf32, #tpu.memory_space<vmem>>, %arg4: memref<8x1xf32, #tpu.memory_space<vmem>>, %arg5: memref<8x1xf32, #tpu.memory_space<vmem>>, %arg6: memref<8x1xf32, #tpu.memory_space<vmem>>, %arg7: memref<1x384xf32, #tpu.memory_space<vmem>>, %arg8: memref<1x128xf32, #tpu.memory_space<vmem>>, %arg9: memref<1xf32, #tpu.memory_space<smem>>, %arg10: memref<8x384xf32, #tpu.memory_space<vmem>>, %arg11: memref<8x128xf32, #tpu.memory_space<vmem>>, %arg12: memref<8x384xf32, #tpu.memory_space<vmem>>, %arg13: memref<8x128xf32, #tpu.memory_space<vmem>>) attributes {dimension_semantics = [#tpu.dimension_semantics<parallel>], iteration_bounds = array<i64: 2>, scalar_prefetch = 0 : i64, scratch_operands = 0 : i64, tpu.core_type = #tpu.core_type<tc>, window_params = [{transform_indices = @transform_0, window_bounds = array<i64: 8, 384>}, {transform_indices = @transform_1, window_bounds = array<i64: 8, 128>}, {pipeline_mode = #tpu.pipeline_mode<synchronous>, transform_indices = @transform_2, window_bounds = array<i64: 8, 1>}, {pipeline_mode = #tpu.pipeline_mode<synchronous>, transform_indices = @transform_3, window_bounds = array<i64: 8, 1>}, {pipeline_mode = #tpu.pipeline_mode<synchronous>, transform_indices = @transform_4, window_bounds = array<i64: 8, 1>}, {pipeline_mode = #tpu.pipeline_mode<synchronous>, transform_indices = @transform_5, window_bounds = array<i64: 8, 1>}, {transform_indices = @transform_6, window_bounds = array<i64: 1, 384>}, {transform_indices = @transform_7, window_bounds = array<i64: 1, 128>}, {transform_indices = @transform_8, window_bounds = array<i64: 1>}, {transform_indices = @transform_9, window_bounds = array<i64: 8, 384>}, {transform_indices = @transform_10, window_bounds = array<i64: 8, 128>}, {transform_indices = @transform_11, window_bounds = array<i64: 8, 384>}, {transform_indices = @transform_12, window_bounds = array<i64: 8, 128>}]} {
    %c0 = arith.constant 0 : index
    %0 = memref.load %arg9[%c0] : memref<1xf32, #tpu.memory_space<smem>>
    %c0_0 = arith.constant 0 : index
    %c0_1 = arith.constant 0 : index
    %1 = vector.load %arg1[%c0_0, %c0_1] : memref<8x384xf32, #tpu.memory_space<vmem>>, vector<8x384xf32>
    %c0_2 = arith.constant 0 : index
    %c0_3 = arith.constant 0 : index
    %2 = vector.load %arg3[%c0_2, %c0_3] : memref<8x1xf32, #tpu.memory_space<vmem>>, vector<8x1xf32>
    %3 = vector.broadcast %2 : vector<8x1xf32> to vector<8x384xf32>
    %4 = arith.mulf %1, %3 : vector<8x384xf32>
    %c0_4 = arith.constant 0 : index
    %c0_5 = arith.constant 0 : index
    %5 = vector.load %arg4[%c0_4, %c0_5] : memref<8x1xf32, #tpu.memory_space<vmem>>, vector<8x1xf32>
    %6 = vector.broadcast %5 : vector<8x1xf32> to vector<8x384xf32>
    %7 = arith.addf %4, %6 : vector<8x384xf32>
    %cst = arith.constant 0.000000e+00 : f32
    %8 = vector.broadcast %cst : f32 to vector<8x384xf32>
    %9 = arith.cmpf ogt, %7, %8 : vector<8x384xf32>
    %10 = vector.broadcast %0 : f32 to vector<8x384xf32>
    %11 = arith.mulf %10, %7 : vector<8x384xf32>
    %12 = arith.select %9, %7, %11 : vector<8x384xi1>, vector<8x384xf32>
    %c0_6 = arith.constant 0 : index
    %c0_7 = arith.constant 0 : index
    %13 = vector.load %arg10[%c0_6, %c0_7] : memref<8x384xf32, #tpu.memory_space<vmem>>, vector<8x384xf32>
    %14 = arith.addf %12, %13 : vector<8x384xf32>
    %c0_8 = arith.constant 0 : index
    %c0_9 = arith.constant 0 : index
    %15 = vector.load %arg7[%c0_8, %c0_9] : memref<1x384xf32, #tpu.memory_space<vmem>>, vector<1x384xf32>
    %16 = vector.broadcast %15 : vector<1x384xf32> to vector<8x384xf32>
    %17 = arith.mulf %14, %16 : vector<8x384xf32>
    %c0_10 = arith.constant 0 : index
    %c0_11 = arith.constant 0 : index
    %18 = vector.load %arg12[%c0_10, %c0_11] : memref<8x384xf32, #tpu.memory_space<vmem>>, vector<8x384xf32>
    tpu.vector_store %arg12[%c0_10, %c0_11], %17 {strides = array<i32>} : memref<8x384xf32, #tpu.memory_space<vmem>>, vector<8x384xf32>,
    %c0_12 = arith.constant 0 : index
    %c0_13 = arith.constant 0 : index
    %19 = vector.load %arg2[%c0_12, %c0_13] : memref<8x128xf32, #tpu.memory_space<vmem>>, vector<8x128xf32>
    %c0_14 = arith.constant 0 : index
    %c0_15 = arith.constant 0 : index
    %20 = vector.load %arg5[%c0_14, %c0_15] : memref<8x1xf32, #tpu.memory_space<vmem>>, vector<8x1xf32>
    %21 = vector.broadcast %20 : vector<8x1xf32> to vector<8x128xf32>
    %22 = arith.mulf %19, %21 : vector<8x128xf32>
    %c0_16 = arith.constant 0 : index
    %c0_17 = arith.constant 0 : index
    %23 = vector.load %arg6[%c0_16, %c0_17] : memref<8x1xf32, #tpu.memory_space<vmem>>, vector<8x1xf32>
    %24 = vector.broadcast %23 : vector<8x1xf32> to vector<8x128xf32>
    %25 = arith.addf %22, %24 : vector<8x128xf32>
    %cst_18 = arith.constant 0.000000e+00 : f32
    %26 = vector.broadcast %cst_18 : f32 to vector<8x128xf32>
    %27 = arith.cmpf ogt, %25, %26 : vector<8x128xf32>
    %28 = vector.broadcast %0 : f32 to vector<8x128xf32>
    %29 = arith.mulf %28, %25 : vector<8x128xf32>
    %30 = arith.select %27, %25, %29 : vector<8x128xi1>, vector<8x128xf32>
    %c0_19 = arith.constant 0 : index
    %c0_20 = arith.constant 0 : index
    %31 = vector.load %arg11[%c0_19, %c0_20] : memref<8x128xf32, #tpu.memory_space<vmem>>, vector<8x128xf32>
    %32 = arith.addf %30, %31 : vector<8x128xf32>
    %c0_21 = arith.constant 0 : index
    %c0_22 = arith.constant 0 : index
    %33 = vector.load %arg8[%c0_21, %c0_22] : memref<1x128xf32, #tpu.memory_space<vmem>>, vector<1x128xf32>
    %34 = vector.broadcast %33 : vector<1x128xf32> to vector<8x128xf32>
    %35 = arith.mulf %32, %34 : vector<8x128xf32>
    %c0_23 = arith.constant 0 : index
    %c0_24 = arith.constant 0 : index
    %36 = vector.load %arg13[%c0_23, %c0_24] : memref<8x128xf32, #tpu.memory_space<vmem>>, vector<8x128xf32>
    tpu.vector_store %arg13[%c0_23, %c0_24], %35 {strides = array<i32>} : memref<8x128xf32, #tpu.memory_space<vmem>>, vector<8x128xf32>,
    return
  }
  func.func @transform_0(%arg0: i32) -> (i32, i32) {
    %c0_i32 = arith.constant 0 : i32
    %c0_i32_0 = arith.constant 0 : i32
    return %c0_i32, %arg0 : i32, i32
  }
  func.func @transform_1(%arg0: i32) -> (i32, i32) {
    %c0_i32 = arith.constant 0 : i32
    %c0_i32_0 = arith.constant 0 : i32
    return %c0_i32, %arg0 : i32, i32
  }
  func.func @transform_2(%arg0: i32) -> (i32, i32) {
    %c0_i32 = arith.constant 0 : i32
    %c0_i32_0 = arith.constant 0 : i32
    %c0_i32_1 = arith.constant 0 : i32
    return %c0_i32, %c0_i32_0 : i32, i32
  }
  func.func @transform_3(%arg0: i32) -> (i32, i32) {
    %c0_i32 = arith.constant 0 : i32
    %c0_i32_0 = arith.constant 0 : i32
    %c0_i32_1 = arith.constant 0 : i32
    return %c0_i32, %c0_i32_0 : i32, i32
  }
  func.func @transform_4(%arg0: i32) -> (i32, i32) {
    %c0_i32 = arith.constant 0 : i32
    %c0_i32_0 = arith.constant 0 : i32
    %c0_i32_1 = arith.constant 0 : i32
    return %c0_i32, %c0_i32_0 : i32, i32
  }
  func.func @transform_5(%arg0: i32) -> (i32, i32) {
    %c0_i32 = arith.constant 0 : i32
    %c0_i32_0 = arith.constant 0 : i32
    %c0_i32_1 = arith.constant 0 : i32
    return %c0_i32, %c0_i32_0 : i32, i32
  }
  func.func @transform_6(%arg0: i32) -> (i32, i32) {
    %c0_i32 = arith.constant 0 : i32
    %c0_i32_0 = arith.constant 0 : i32
    return %c0_i32, %arg0 : i32, i32
  }
  func.func @transform_7(%arg0: i32) -> (i32, i32) {
    %c0_i32 = arith.constant 0 : i32
    %c0_i32_0 = arith.constant 0 : i32
    return %c0_i32, %arg0 : i32, i32
  }
  func.func @transform_8(%arg0: i32) -> i32 {
    %c0_i32 = arith.constant 0 : i32
    %c0_i32_0 = arith.constant 0 : i32
    return %c0_i32 : i32
  }
  func.func @transform_9(%arg0: i32) -> (i32, i32) {
    %c0_i32 = arith.constant 0 : i32
    %c0_i32_0 = arith.constant 0 : i32
    return %c0_i32, %arg0 : i32, i32
  }
  func.func @transform_10(%arg0: i32) -> (i32, i32) {
    %c0_i32 = arith.constant 0 : i32
    %c0_i32_0 = arith.constant 0 : i32
    return %c0_i32, %arg0 : i32, i32
  }
  func.func @transform_11(%arg0: i32) -> (i32, i32) {
    %c0_i32 = arith.constant 0 : i32
    %c0_i32_0 = arith.constant 0 : i32
    return %c0_i32, %arg0 : i32, i32
  }
  func.func @transform_12(%arg0: i32) -> (i32, i32) {
    %c0_i32 = arith.constant 0 : i32
    %c0_i32_0 = arith.constant 0 : i32
    return %c0_i32, %arg0 : i32, i32
  }
}

</mosaic_0001>

<bundles_post_ra>
// kernel: tile.28
= control target key start
LH: loop header
LB: loop body
LE: loop exit
PB: predicated region body
PF: predicated region fallthrough
CT: control target
= control target key end

     0   :  { %s22_s0 = inlined_call_operand.vmem [shape: f32[128], index: 0, kind: input, shape index: {}]   ;;  %s23_s1 = inlined_call_operand.vmem [shape: f32[2,128], index: 1, kind: output, shape index: {}]  }
   0x1   :  { %v4_v0 = vld [vmem:[%s22_s0] ss:$0 sm:$0xff] }
   0x2   :  { %5 = vst [vmem:[%s23_s1] sm:$0x3] %v4_v0 }

// kernel: res_block_pallas.6
= control target key start
LH: loop header
LB: loop body
LE: loop exit
PB: predicated region body
PF: predicated region fallthrough
CT: control target
= control target key end

     0   :  { %s768_s24 = smov 0   ;;  %s840_s0 = inlined_call_operand.vmem [shape: f32[8,256], index: 0, kind: input, shape index: {}]   ;;  %s841_s1 = inlined_call_operand.vmem [shape: f32[8,256], index: 1, kind: input, shape index: {}]   ;;  %s842_s2 = inlined_call_operand.vmem [shape: bf16[8,72], index: 2, kind: input, shape index: {}]   ;;  %s843_s3 = inlined_call_operand.vmem [shape: bf16[8,144], index: 3, kind: input, shape index: {}]   ;;  %s844_s4 = inlined_call_operand.vmem [shape: f32[1,256], index: 4, kind: input, shape index: {}]   ;;  %s845_s5 = inlined_call_operand.vmem [shape: f32[8,256], index: 5, kind: output, shape index: {0}]   ;;  %s846_s6 = inlined_call_operand.vmem [shape: f32[8,256], index: 6, kind: output, shape index: {1}]   ;;  %s847_s7 = inlined_call_operand.vmem [shape: f32[2,8,2], index: 7, kind: output, shape index: {2}]  }
   0x1 LB: > { %s674_s25 = sadd.s32 4294967295, %s717_s24   ;;  %p678_p0 = scmp.ge.s32.totalorder %s717_s24, 1  ;;  %s717_s24 = sphi %s768_s24, %s18_s24  }
   0x2   : > { %p258_p1 = scmp.lt.s32.totalorder %s717_s24, 3 }
   0x4   : > { %p259_p2 = pnand %p678_p0, %p258_p1 }
   0x5   : > { %p303_p3 = scmp.lt.s32.totalorder (!%p259_p2), %s674_s25, 1  ;;  %s719_s30 = smov (!%p259_p2), 118  }
   0x6   : > { %262 = sbr.rel (%p259_p2) target bundleno = 537 (0x219), region = 40  ;;  %s720_s8 = smov (!%p259_p2), 116  }
   0x7   : > { %s721_s9 = smov (!%p259_p2), 127   ;;  %s722_s10 = smov (!%p259_p2), 117  }
   0x8   : > { %s723_s11 = smov (!%p259_p2), 108   ;;  %s724_s15 = smov (!%p259_p2), 126  }
   0x9   : > { %s725_s16 = smov (!%p259_p2), 106   ;;  %s726_s17 = smov (!%p259_p2), 107  }
   0xa   : > { %s727_s18 = smov (!%p259_p2), 11  }
   0xb   : > { %s849_s25 = smov (!%p303_p3, %s674_s25), 1  ;;  %v441_v38 = vld [vmem:[%s843_s3] sm:$0xff]  ;;  %vm493_vm0 = vcmask 130048   ;;  %vm414_vm1 = vcmask 1043456   ;;  %vm410_vm2 = vcmask 588800   ;;  %vm534_vm3 = vcmask 7168  }
   0xc   : > { %s779_s26 = sshll.u32 %s849_s25, 3  ;;  %v444_v39 = vunpack.c.h.b16 %v441_v38  ;;  %v443_v46 = vunpack.c.l.b16 %v441_v38  ;;  %s313_s23 = scalar_lea.vmem %s844_s4, %s849_s25  ;;  %v379_v54 = vld [vmem:[%s842_s2] sm:$0xf]  ;;  %vm536_vm4 = vcmask 15360  }
   0xd   : > { %s306_s29 = scalar_lea.vmem %s840_s0, %s779_s26  ;;  %s310_s14 = scalar_lea.vmem %s841_s1, %s779_s26  ;;  %v710_v56 = vld [vmem:[%s313_s23] ss:$0 sm:$0xff] }
   0xe   : > { %v785_v0 = vld [vmem:[%s306_s29] sm:$0xff]  ;;  %v446_v43 = vpack.c.b16 %v444_v39, %v444_v39  ;;  %v445_v49 = vpack.c.b16 %v443_v46, %v443_v46  ;;  %s325_s13 = scalar_lea.vmem %s847_s7, %s779_s26 }
   0xf   : > { %335 = vrot.lane.b32.xlu1 %v785_v0, %s719_s30  ;;  %341 = vrot.lane.b32.xlu0 %v785_v0, %s720_s8  ;;  %v353_v1 = vld [vmem:[%s310_s14] sm:$0xff] }
  0x10   : > { %329 = vrot.lane.b32.xlu2 %v785_v0, %s721_s9  ;;  %v705_v2 = vpack.i.bf16 %v785_v0, %v353_v1 }
  0x17   : > { %338 = vrot.lane.b32.xlu1 %v785_v0, %s722_s10  ;;  %344 = vrot.lane.b32.xlu0 %v785_v0, %s723_s11 }
  0x18   : > { %332 = vrot.lane.b32.xlu2 %v785_v0, %s724_s15 }
  0x1f   : > { %370 = vrot.lane.b32.xlu1 %v353_v1, %s723_s11  ;;  %376 = vrot.lane.b32.xlu0 %v353_v1, %s725_s16 }
  0x20   : > { %706 = vrot.lane.b32.xlu2 %v705_v2, %s726_s17 }
  0x27   : > { %367 = vrot.lane.b32.xlu1 %v353_v1, %s720_s8  ;;  %364 = vrot.lane.b32.xlu0 %v353_v1, %s722_s10  ;;  %s317_s10 = scalar_lea.vmem %s845_s5, %s779_s26 }
  0x28   : > { %350 = vrot.lane.b32.xlu2 %v785_v0, %s725_s16 }
  0x2f   : > { %361 = vrot.lane.b32.xlu1 %v353_v1, %s719_s30  ;;  %358 = vrot.lane.b32.xlu0 %v353_v1, %s724_s15  ;;  %s321_s30 = scalar_lea.vmem %s846_s6, %s779_s26 }
  0x30   : > { %355 = vrot.lane.b32.xlu2 %v353_v1, %s721_s9 }
  0x6a   : > { %v330_v3 = vpop.permute.xlu2 %329 }
  0x6b   : > { %v380_v33 = vpack.c.bf16 %v330_v3, %v785_v0 }
  0x72   : > { %v333_v4 = vpop.permute.xlu2 %332 }
  0x73   : > { %v437_v5 = vpack.c.bf16 %v333_v4, %v330_v3 }
  0x75   : > { %467 = vrot.lane.b32.xlu2 %v437_v5, %s727_s18 }
  0x7a   : > { %v707_v12 = vpop.permute.xlu2 %706 }
  0x7b   : > { %v708_v13 = vunpack.i.l.bf16 %v707_v12  ;;  %v709_v19 = vunpack.i.h.bf16 %v707_v12 }
  0x81   : > { %v336_v6 = vpop.permute.xlu1 %335  ;;  %v342_v7 = vpop.permute.xlu0 %341 }
  0x82   : > { %v351_v18 = vpop.permute.xlu2 %350  ;;  %v381_v30 = vpack.c.bf16 %v336_v6, %v333_v4 }
  0x83   : > { %v440_v20 = vpack.c.bf16 %v351_v18, %v709_v19  ;;  %v384_v28 = vpack.c.bf16 %v351_v18, %v351_v18 }
  0x89   : > { %v339_v8 = vpop.permute.xlu1 %338  ;;  %v345_v9 = vpop.permute.xlu0 %344 }
  0x8a   : > { %v438_v10 = vpack.c.bf16 %v339_v8, %v336_v6  ;;  %v439_v11 = vpack.c.bf16 %v345_v9, %v342_v7  ;;  %v356_v24 = vpop.permute.xlu2 %355  ;;  %v382_v31 = vpack.c.bf16 %v342_v7, %v339_v8  ;;  %v383_v32 = vpack.c.bf16 %v709_v19, %v345_v9 }
  0x8b   : > { %v432_v25 = vpack.c.bf16 %v356_v24, %v353_v1 }
  0x8c   : > { %469 = vrot.lane.b32.xlu1 %v438_v10, %s727_s18  ;;  %471 = vrot.lane.b32.xlu0 %v439_v11, %s727_s18 }
  0x91   : > { %v371_v14 = vpop.permute.xlu1 %370  ;;  %v377_v15 = vpop.permute.xlu0 %376 }
  0x92   : > { %v435_v16 = vpack.c.bf16 %v708_v13, %v371_v14  ;;  %v436_v17 = vpack.c.bf16 %v785_v0, %v377_v15 }
  0x94   : > { %463 = vrot.lane.b32.xlu1 %v435_v16, %s727_s18  ;;  %465 = vrot.lane.b32.xlu0 %v436_v17, %s727_s18 }
  0x99   : > { %v368_v21 = vpop.permute.xlu1 %367  ;;  %v365_v22 = vpop.permute.xlu0 %364 }
  0x9a   : > { %v434_v23 = vpack.c.bf16 %v368_v21, %v365_v22 }
  0x9c   : > { %473 = vrot.lane.b32.xlu0 %v440_v20, %s727_s18  ;;  %461 = vrot.lane.b32.xlu2 %v434_v23, %s727_s18 }
  0xa1   : > { %v362_v26 = vpop.permute.xlu1 %361  ;;  %v359_v27 = vpop.permute.xlu0 %358 }
  0xa2   : > { %v433_v29 = vpack.c.bf16 %v362_v26, %v359_v27 }
  0xa4   : > { %398 = vrot.lane.b32.xlu0 %v384_v28, %s727_s18  ;;  %457 = vrot.lane.b32.xlu2 %v432_v25, %s727_s18 }
  0xa5   : > { %459 = vrot.lane.b32.xlu1 %v433_v29, %s727_s18 }
  0xac   : > { %392 = vrot.lane.b32.xlu0 %v381_v30, %s727_s18  ;;  %394 = vrot.lane.b32.xlu2 %v382_v31, %s727_s18 }
  0xad   : > { %396 = vrot.lane.b32.xlu1 %v383_v32, %s727_s18 }
  0xb5   : > { %390 = vrot.lane.b32.xlu1 %v380_v33, %s727_s18 }
  0xcf   : > { %v468_v36 = vpop.permute.xlu2 %467 }
  0xf6   : > { %v462_v40 = vpop.permute.xlu2 %461 }
  0xfe   : > { %v472_v34 = vpop.permute.xlu0 %471  ;;  %v470_v35 = vpop.permute.xlu1 %469 }
  0xff   : > { %497 = vmatpush.bf16.msra.mxu1 %v472_v34  ;;  %v458_v48 = vpop.permute.xlu2 %457 }
 0x103   : > { %498 = vmatpush.bf16.msra.mxu1 %v470_v35 }
 0x106   : > { %v466_v37 = vpop.permute.xlu0 %465  ;;  %v464_v41 = vpop.permute.xlu1 %463 }
 0x107   : > { %499 = vmatpush.bf16.msra.mxu1 %v468_v36  ;;  %v395_v51 = vpop.permute.xlu2 %394 }
 0x10b   : > { %500 = vmatpush.bf16.msra.mxu1 %v466_v37 }
 0x10e   : > { %v474_v42 = vpop.permute.xlu0 %473 }
 0x10f   : > { %501 = vmatpush.bf16.msra.mxu1 %v464_v41  ;;  %517 = vmatpush.bf16.msra.mxu2 %v474_v42 }
 0x112   : > { %685 = vmatmul.msk.bf16.vlgmr.msra.gmra.mxu2 %vm493_vm0, %v446_v43 }
 0x113   : > { %502 = vmatpush.bf16.msra.mxu1 %v462_v40 }
 0x116   : > { %v399_v45 = vpop.permute.xlu0 %398 }
 0x117   : > { %v460_v44 = vpop.permute.xlu1 %459  ;;  %v416_v47 = vsel %vm414_vm1, %v399_v45, 0 }
 0x118   : > { %503 = vmatpush.bf16.msra.mxu1 %v460_v44  ;;  %421 = vmatpush.bf16.msra.mxu0 %v416_v47 }
 0x11c   : > { %504 = vmatpush.bf16.msra.mxu1 %v458_v48 }
 0x11e   : > { %v393_v52 = vpop.permute.xlu0 %392 }
 0x11f   : > { %v397_v50 = vpop.permute.xlu1 %396  ;;  %505 = vmatmul.bf16.vlgmr.msra.gmra.mxu1 %v445_v49 }
 0x120   : > { %422 = vmatpush.bf16.msra.mxu0 %v397_v50 }
 0x124   : > { %423 = vmatpush.bf16.msra.mxu0 %v395_v51 }
 0x127   : > { %v391_v53 = vpop.permute.xlu1 %390 }
 0x128   : > { %424 = vmatpush.bf16.msra.mxu0 %v393_v52 }
 0x12c   : > { %425 = vmatpush.bf16.msra.mxu0 %v391_v53 }
 0x12f   : > { %684 = vmatmul.msk.bf16.vlgmr.msra.gmra.mxu0 %vm410_vm2, %v379_v54 }
 0x195   : > { %v519_v55 = vpop.f32.mrf.mxu2 }
 0x19c   : > { %v506_v57 = vpop.f32.mrf.mxu1 }
 0x19d   : > { %v520_v58 = vadd.f32 %v519_v55, %v506_v57  ;;  %v521_v59 = vpop.f32.mrf.mxu2 }
 0x19f   : > { %523 = vst [vmem:[%s321_s30] sm:$0xff] %v520_v58  ;;  %v528_v60 = vmul.f32 %v710_v56, %v520_v58 }
 0x1a1   : > { %529 = vadd.xlane.f32.xlu2 %v528_v60  ;;  %v531_v61 = vmul.f32 %v528_v60, %v520_v58 }
 0x1a3   : > { %532 = vadd.xlane.f32.xlu0 %v531_v61 }
 0x1a4   : > { %v508_v62 = vpop.f32.mrf.mxu1 }
 0x1ac   : > { %v427_v63 = vpop.f32.mrf.mxu0 }
 0x1ad   : > { %431 = vst [vmem:[%s317_s10] sm:$0xff] %v427_v63 }
 0x1b4   : > { %v429_v0 = vpop.f32.mrf.mxu0 }
 0x214   : > { %v530_v1 = vpop.xlane.xlu2 %529 }
 0x216   : > { %v533_v2 = vpop.xlane.xlu0 %532 }
 0x217   : > { %v535_v3 = vsel %vm534_vm3, %v530_v1, %v533_v2 }
 0x218   : > { %537 = vst.msk [vmem:[%s325_s13] sm:$0xff] %vm536_vm4, %v535_v3 }
 0x219 PF: > { %s18_s24 = sadd.s32 1, %s717_s24  }
 0x21a   : > { %p15_p4 = scmp.ge.s32.totalorder %s18_s24, 4  }
 0x21c   :  { %17 = sbr.rel (!%p15_p4) target bundleno = 1 (0x1), region = 100 }

// kernel: res_block_pallas.7
= control target key start
LH: loop header
LB: loop body
LE: loop exit
PB: predicated region body
PF: predicated region fallthrough
CT: control target
= control target key end

     0   :  { %s818_s18 = smov 0   ;;  %s971_s0 = inlined_call_operand.vmem [shape: f32[8,768], index: 0, kind: input, shape index: {}]   ;;  %s972_s1 = inlined_call_operand.vmem [shape: f32[8,768], index: 1, kind: input, shape index: {}]   ;;  %s973_s2 = inlined_call_operand.vmem [shape: bf16[8,72], index: 2, kind: input, shape index: {}]   ;;  %s974_s3 = inlined_call_operand.vmem [shape: f32[1,768], index: 3, kind: input, shape index: {}]   ;;  %s975_s4 = inlined_call_operand.vmem [shape: f32[8,768], index: 4, kind: output, shape index: {0}]   ;;  %s976_s5 = inlined_call_operand.vmem [shape: f32[2,8,2], index: 5, kind: output, shape index: {1}]  }
   0x1 LB: > { %s824_s19 = sadd.s32 4294967295, %s777_s18   ;;  %p704_p0 = scmp.ge.s32.totalorder %s777_s18, 1  ;;  %s777_s18 = sphi %s818_s18, %s16_s18  }
   0x2   : > { %p212_p1 = scmp.lt.s32.totalorder %s777_s18, 3 }
   0x4   : > { %p213_p2 = pnand %p704_p0, %p212_p1 }
   0x5   : > { %s253_s20 = smul.u32 (!%p213_p2), 3, %s824_s19  ;;  %s779_s25 = smov (!%p213_p2), 92  }
   0x6   : > { %216 = sbr.rel (%p213_p2) target bundleno = 573 (0x23d), region = 36  ;;  %s780_s26 = smov (!%p213_p2), 90  }
   0x7   : > { %p254_p3 = scmp.lt.s32.totalorder (!%p213_p2), %s253_s20, 5  ;;  %s781_s27 = smov (!%p213_p2), 91  }
   0x8   : > { %s782_s28 = smov (!%p213_p2), 108   ;;  %s783_s29 = smov (!%p213_p2), 109  }
   0x9   : > { %s784_s30 = smov (!%p213_p2), 110   ;;  %s785_s6 = smov (!%p213_p2), 126  }
   0xa   : > { %s786_s7 = smov (!%p213_p2), 127   ;;  %s787_s8 = smov (!%p213_p2), 19  }
   0xb   : > { %s978_s20 = smov (!%p254_p3, %s253_s20), 5  ;;  %vm390_vm0 = vcmask 736256   ;;  %vm376_vm1 = vcmask 744448   ;;  %vm362_vm2 = vcmask 752640   ;;  %vm348_vm3 = vcmask 883712   ;;  %p276_p4 = scmp.lt.s32.totalorder %s824_s19, 1 }
   0xc   : > { %s832_s21 = sshll.u32 %s978_s20, 3  ;;  %vm307_vm4 = vcmask 1031168   ;;  %vm321_vm5 = vcmask 900096   ;;  %vm293_vm6 = vcmask 1039360   ;;  %vm335_vm7 = vcmask 891904   ;;  %s268_s16 = scalar_lea.vmem %s974_s3, %s978_s20 }
   0xd   : > { %s257_s24 = scalar_lea.vmem %s971_s0, %s832_s21  ;;  %vm514_vm8 = vcmask 1043456   ;;  %vm482_vm9 = vcmask 154624   ;;  %vm510_vm10 = vcmask 588800   ;;  %s263_s13 = scalar_lea.vmem %s972_s1, %s832_s21  ;;  %vm588_vm11 = vcmask 7168  }
   0xe   : > { %v838_v0 = vld [vmem:[%s257_s24] sm:$0xff]  ;;  %v840_v1 = vld [vmem:[%s257_s24 + $0x8] sm:$0xff]  ;;  %v844_v3 = vld [vmem:[%s257_s24 + $0x10] sm:$0xff]  ;;  %s274_s23 = scalar_lea.vmem %s975_s4, %s832_s21  ;;  %s980_s19 = smov (!%p276_p4, %s824_s19), 1  ;;  %vm590_vm12 = vcmask 15360  }
   0xf   : > { %v736_v2 = vpack.i.bf16 %v840_v1, %v838_v0  ;;  %v746_v4 = vpack.i.bf16 %v844_v3, %v840_v1  ;;  %v761_v5 = vpack.i.bf16 %v840_v1, %v844_v3  ;;  %s708_s20 = sshll.u32 %s980_s19, 3 }
  0x11   : > { %737 = vrot.lane.b32.xlu1 %v736_v2, %s779_s25  ;;  %732 = vrot.lane.b32.xlu0 %v736_v2, %s780_s26 }
  0x12   : > { %742 = vrot.lane.b32.xlu2 %v736_v2, %s781_s27 }
  0x19   : > { %360 = vrot.lane.b32.xlu1 %v844_v3, %s779_s25  ;;  %388 = vrot.lane.b32.xlu0 %v844_v3, %s780_s26  ;;  %s279_s25 = scalar_lea.vmem %s976_s5, %s708_s20 }
  0x1a   : > { %374 = vrot.lane.b32.xlu2 %v844_v3, %s781_s27 }
  0x21   : > { %752 = vrot.lane.b32.xlu1 %v736_v2, %s782_s28  ;;  %747 = vrot.lane.b32.xlu0 %v746_v4, %s783_s29 }
  0x22   : > { %346 = vrot.lane.b32.xlu2 %v844_v3, %s782_s28 }
  0x29   : > { %762 = vrot.lane.b32.xlu1 %v761_v5, %s784_s30  ;;  %757 = vrot.lane.b32.xlu0 %v761_v5, %s785_s6 }
  0x2a   : > { %329 = vrot.lane.b32.xlu2 %v838_v0, %s783_s29 }
  0x31   : > { %303 = vrot.lane.b32.xlu1 %v838_v0, %s785_s6  ;;  %767 = vrot.lane.b32.xlu0 %v761_v5, %s786_s7 }
  0x32   : > { %317 = vrot.lane.b32.xlu2 %v838_v0, %s784_s30 }
  0x39   : > { %289 = vrot.lane.b32.xlu0 %v838_v0, %s786_s7 }
  0x6c   : > { %v858_v6 = vpop.permute.xlu2 %742 }
  0x6d   : > { %v869_v16 = vunpack.i.l.bf16 %v858_v6  ;;  %v745_v20 = vunpack.i.h.bf16 %v858_v6 }
  0x74   : > { %v375_v7 = vpop.permute.xlu2 %374 }
  0x75   : > { %v378_v26 = vsel %vm376_vm1, %v745_v20, %v375_v7  ;;  %v379_v49 = vsel %vm376_vm1, %v375_v7, %v869_v16 }
  0x7c   : > { %v863_v12 = vpop.permute.xlu2 %346 }
  0x83   : > { %v860_v8 = vpop.permute.xlu1 %737  ;;  %v733_v9 = vpop.permute.xlu0 %732 }
  0x84   : > { %v734_v10 = vunpack.i.l.bf16 %v733_v9  ;;  %v866_v13 = vunpack.i.l.bf16 %v860_v8  ;;  %v740_v21 = vunpack.i.h.bf16 %v860_v8  ;;  %v330_v23 = vpop.permute.xlu2 %329  ;;  %v735_v30 = vunpack.i.h.bf16 %v733_v9 }
  0x86   : > { %v414_v11 = vpack.c.bf16 %v734_v10, %v734_v10  ;;  %v410_v19 = vpack.c.bf16 %v869_v16, %v866_v13  ;;  %v391_v45 = vsel %vm390_vm0, %v734_v10, %v735_v30 }
  0x87   : > { %v415_v50 = vpack.c.bf16 %v391_v45, %v391_v45 }
  0x88   : > { %474 = vrot.lane.b32.xlu0 %v414_v11, %s787_s8 }
  0x8b   : > { %v361_v14 = vpop.permute.xlu1 %360  ;;  %v389_v15 = vpop.permute.xlu0 %388 }
  0x8c   : > { %v393_v17 = vsel %vm390_vm0, %v389_v15, %v734_v10  ;;  %v364_v22 = vsel %vm362_vm2, %v740_v21, %v361_v14  ;;  %v392_v33 = vsel %vm390_vm0, %v735_v30, %v389_v15  ;;  %v365_v46 = vsel %vm362_vm2, %v361_v14, %v866_v13  ;;  %v318_v2 = vpop.permute.xlu2 %317 }
  0x8d   : > { %v417_v18 = vpack.c.bf16 %v393_v17, %v393_v17  ;;  %v412_v28 = vpack.c.bf16 %v378_v26, %v364_v22  ;;  %v416_v41 = vpack.c.bf16 %v392_v33, %v392_v33  ;;  %v413_v53 = vpack.c.bf16 %v379_v49, %v365_v46 }
  0x8f   : > { %480 = vrot.lane.b32.xlu2 %v417_v18, %s787_s8 }
  0x90   : > { %466 = vrot.lane.b32.xlu0 %v410_v19, %s787_s8 }
  0x93   : > { %v753_v24 = vpop.permute.xlu1 %752  ;;  %v748_v25 = vpop.permute.xlu0 %747 }
  0x94   : > { %v754_v27 = vunpack.i.l.bf16 %v753_v24  ;;  %v750_v31 = vunpack.i.h.bf16 %v748_v25  ;;  %v755_v54 = vunpack.i.h.bf16 %v753_v24  ;;  %v749_v55 = vunpack.i.l.bf16 %v748_v25 }
  0x96   : > { %v406_v29 = vpack.c.bf16 %v754_v27, %v330_v23  ;;  %v351_v32 = vsel %vm348_vm3, %v863_v12, %v754_v27  ;;  %v336_v57 = vsel %vm335_vm7, %v330_v23, %v749_v55  ;;  %v349_v58 = vsel %vm348_vm3, %v754_v27, %v755_v54 }
  0x97   : > { %470 = vrot.lane.b32.xlu2 %v412_v28, %s787_s8  ;;  %v409_v40 = vpack.c.bf16 %v351_v32, %v750_v31  ;;  %v337_v59 = vsel %vm335_vm7, %v749_v55, %v750_v31  ;;  %v350_v60 = vsel %vm348_vm3, %v755_v54, %v863_v12  ;;  %v407_v62 = vpack.c.bf16 %v349_v58, %v336_v57  ;;  %v566_v57 = vld [vmem:[%s268_s16] sm:$0x7] }
  0x98   : > { %458 = vrot.lane.b32.xlu1 %v406_v29, %s787_s8  ;;  %v408_v63 = vpack.c.bf16 %v350_v60, %v337_v59  ;;  %v377_v12 = vsel %vm376_vm1, %v869_v16, %v745_v20  ;;  %v569_v60 = vperm.slane %v566_v57, 1 }
  0x9b   : > { %v763_v34 = vpop.permute.xlu1 %762  ;;  %v758_v35 = vpop.permute.xlu0 %757 }
  0x9c   : > { %v765_v36 = vunpack.i.h.bf16 %v763_v34  ;;  %v764_v37 = vunpack.i.l.bf16 %v763_v34  ;;  %v760_v38 = vunpack.i.h.bf16 %v758_v35  ;;  %v759_v39 = vunpack.i.l.bf16 %v758_v35 }
  0x9e   : > { %v405_v42 = vpack.c.bf16 %v764_v37, %v759_v39  ;;  %v310_v43 = vsel %vm307_vm4, %v760_v38, %v759_v39  ;;  %v324_v44 = vsel %vm321_vm5, %v765_v36, %v764_v37  ;;  %v322_v5 = vsel %vm321_vm5, %v764_v37, %v318_v2 }
  0x9f   : > { %464 = vrot.lane.b32.xlu2 %v409_v40, %s787_s8  ;;  %v404_v47 = vpack.c.bf16 %v324_v44, %v310_v43  ;;  %v323_v9 = vsel %vm321_vm5, %v318_v2, %v765_v36  ;;  %v568_v2 = vperm.slane %v566_v57, 0 }
  0xa0   : > { %478 = vrot.lane.b32.xlu1 %v416_v41, %s787_s8  ;;  %456 = vrot.lane.b32.xlu0 %v405_v42, %s787_s8 }
  0xa3   : > { %v768_v48 = vpop.permute.xlu0 %767  ;;  %v304_v4 = vpop.permute.xlu1 %303 }
  0xa4   : > { %v770_v51 = vunpack.i.h.bf16 %v768_v48  ;;  %v769_v52 = vunpack.i.l.bf16 %v768_v48  ;;  %v308_v7 = vsel %vm307_vm4, %v759_v39, %v304_v4  ;;  %v309_v10 = vsel %vm307_vm4, %v304_v4, %v760_v38 }
  0xa5   : > { %v402_v11 = vpack.c.bf16 %v322_v5, %v308_v7  ;;  %v403_v14 = vpack.c.bf16 %v323_v9, %v309_v10  ;;  %v570_v4 = vperm.slane %v566_v57, 2 }
  0xa6   : > { %v296_v56 = vsel %vm293_vm6, %v770_v51, %v769_v52 }
  0xa7   : > { %454 = vrot.lane.b32.xlu2 %v404_v47, %s787_s8  ;;  %v400_v61 = vpack.c.bf16 %v296_v56, %v840_v1  ;;  %v363_v1 = vsel %vm362_vm2, %v866_v13, %v740_v21  ;;  %v401_v13 = vpack.c.bf16 %v769_v52, %v844_v3  ;;  %v420_v56 = vld [vmem:[%s263_s13 + $0x8] sm:$0xff] }
  0xa8   : > { %472 = vrot.lane.b32.xlu0 %v413_v53, %s787_s8  ;;  %476 = vrot.lane.b32.xlu1 %v415_v50, %s787_s8  ;;  %v411_v15 = vpack.c.bf16 %v377_v12, %v363_v1 }
  0xab   : > { %v290_v17 = vpop.permute.xlu0 %289 }
  0xac   : > { %v295_v8 = vsel %vm293_vm6, %v290_v17, %v770_v51  ;;  %v294_v6 = vsel %vm293_vm6, %v769_v52, %v290_v17  ;;  %v418_v51 = vld [vmem:[%s973_s2] sm:$0xf] }
  0xad   : > { %v399_v18 = vpack.c.bf16 %v295_v8, %v838_v0  ;;  %v398_v16 = vpack.c.bf16 %v294_v6, %v844_v3 }
  0xaf   : > { %460 = vrot.lane.b32.xlu2 %v407_v62, %s787_s8  ;;  %v419_v62 = vld [vmem:[%s263_s13] sm:$0xff] }
  0xb0   : > { %446 = vrot.lane.b32.xlu0 %v400_v61, %s787_s8  ;;  %462 = vrot.lane.b32.xlu1 %v408_v63, %s787_s8  ;;  %v421_v61 = vld [vmem:[%s263_s13 + $0x10] sm:$0xff] }
  0xb7   : > { %450 = vrot.lane.b32.xlu2 %v402_v11, %s787_s8 }
  0xb8   : > { %452 = vrot.lane.b32.xlu0 %v403_v14, %s787_s8  ;;  %468 = vrot.lane.b32.xlu1 %v411_v15, %s787_s8 }
  0xbf   : > { %444 = vrot.lane.b32.xlu2 %v399_v18, %s787_s8 }
  0xc0   : > { %448 = vrot.lane.b32.xlu1 %v401_v13, %s787_s8 }
  0xc8   : > { %442 = vrot.lane.b32.xlu1 %v398_v16, %s787_s8 }
  0xe9   : > { %v481_v19 = vpop.permute.xlu2 %480 }
  0xf1   : > { %v471_v21 = vpop.permute.xlu2 %470 }
  0xf9   : > { %v465_v24 = vpop.permute.xlu2 %464 }
  0xfa   : > { %v475_v20 = vpop.permute.xlu0 %474 }
 0x101   : > { %v455_v28 = vpop.permute.xlu2 %454 }
 0x102   : > { %v467_v22 = vpop.permute.xlu0 %466 }
 0x109   : > { %v461_v35 = vpop.permute.xlu2 %460 }
 0x10a   : > { %v459_v23 = vpop.permute.xlu1 %458 }
 0x10b   : > { %v489_v44 = vsel %vm482_vm9, %v459_v23, %v461_v35 }
 0x111   : > { %v451_v43 = vpop.permute.xlu2 %450 }
 0x112   : > { %v479_v0 = vpop.permute.xlu1 %478  ;;  %v457_v25 = vpop.permute.xlu0 %456 }
 0x113   : > { %v497_v26 = vsel %vm482_vm9, %v479_v0, %v481_v19  ;;  %v488_v39 = vsel %vm482_vm9, %v455_v28, %v457_v25 }
 0x114   : > { %v522_v27 = vsel %vm514_vm8, %v497_v26, 0 }
 0x115   : > { %553 = vmatpush.bf16.msra.mxu2 %v522_v27 }
 0x119   : > { %v445_v52 = vpop.permute.xlu2 %444 }
 0x11a   : > { %v473_v29 = vpop.permute.xlu0 %472  ;;  %v477_v30 = vpop.permute.xlu1 %476 }
 0x11b   : > { %v494_v3 = vsel %vm482_vm9, %v471_v21, %v473_v29  ;;  %v495_v31 = vsel %vm482_vm9, %v475_v20, %v477_v30  ;;  %v496_v32 = vsel %vm482_vm9, %v477_v30, %v479_v0 }
 0x11c   : > { %554 = vmatpush.bf16.msra.mxu2 %v494_v3  ;;  %v516_v33 = vsel %vm514_vm8, %v495_v31, 0  ;;  %v519_v34 = vsel %vm514_vm8, %v496_v32, 0 }
 0x11d   : > { %527 = vmatpush.bf16.msra.mxu0 %v516_v33  ;;  %540 = vmatpush.bf16.msra.mxu1 %v519_v34 }
 0x122   : > { %v463_v36 = vpop.permute.xlu1 %462  ;;  %v447_v38 = vpop.permute.xlu0 %446 }
 0x123   : > { %v491_v37 = vsel %vm482_vm9, %v463_v36, %v465_v24  ;;  %v490_v45 = vsel %vm482_vm9, %v461_v35, %v463_v36  ;;  %v484_v53 = vsel %vm482_vm9, %v445_v52, %v447_v38 }
 0x124   : > { %555 = vmatpush.bf16.msra.mxu2 %v491_v37 }
 0x128   : > { %556 = vmatpush.bf16.msra.mxu2 %v488_v39 }
 0x12a   : > { %v469_v40 = vpop.permute.xlu1 %468  ;;  %v453_v46 = vpop.permute.xlu0 %452 }
 0x12b   : > { %v492_v41 = vsel %vm482_vm9, %v467_v22, %v469_v40  ;;  %v493_v42 = vsel %vm482_vm9, %v469_v40, %v471_v21  ;;  %v486_v48 = vsel %vm482_vm9, %v451_v43, %v453_v46  ;;  %v487_v49 = vsel %vm482_vm9, %v453_v46, %v455_v28 }
 0x12c   : > { %528 = vmatpush.bf16.msra.mxu0 %v492_v41  ;;  %541 = vmatpush.bf16.msra.mxu1 %v493_v42 }
 0x130   : > { %529 = vmatpush.bf16.msra.mxu0 %v489_v44  ;;  %542 = vmatpush.bf16.msra.mxu1 %v490_v45 }
 0x132   : > { %v449_v47 = vpop.permute.xlu1 %448 }
 0x133   : > { %v485_v50 = vsel %vm482_vm9, %v447_v38, %v449_v47 }
 0x134   : > { %530 = vmatpush.bf16.msra.mxu0 %v486_v48  ;;  %543 = vmatpush.bf16.msra.mxu1 %v487_v49 }
 0x135   : > { %557 = vmatpush.bf16.msra.mxu2 %v485_v50 }
 0x138   : > { %711 = vmatmul.msk.bf16.vlgmr.msra.gmra.mxu2 %vm510_vm10, %v418_v51  ;;  %544 = vmatpush.bf16.msra.mxu1 %v484_v53 }
 0x13a   : > { %v443_v54 = vpop.permute.xlu1 %442 }
 0x13b   : > { %710 = vmatmul.msk.bf16.vlgmr.msra.gmra.mxu1 %vm510_vm10, %v418_v51  ;;  %v483_v55 = vsel %vm482_vm9, %v443_v54, %v445_v52 }
 0x13c   : > { %531 = vmatpush.bf16.msra.mxu0 %v483_v55 }
 0x13f   : > { %709 = vmatmul.msk.bf16.vlgmr.msra.gmra.mxu0 %vm510_vm10, %v418_v51 }
 0x1b8   : > { %v546_v58 = vpop.f32.mrf.mxu1 }
 0x1b9   : > { %v547_v59 = vadd.f32 %v546_v58, %v420_v56 }
 0x1bb   : > { %564 = vst [vmem:[%s274_s23 + $0x8] sm:$0xff] %v547_v59  ;;  %v559_v63 = vpop.f32.mrf.mxu2  ;;  %v575_v9 = vmul.f32 %v569_v60, %v547_v59 }
 0x1bc   : > { %v560_v5 = vadd.f32 %v559_v63, %v421_v61  ;;  %v533_v7 = vpop.f32.mrf.mxu0 }
 0x1bd   : > { %v534_v10 = vadd.f32 %v533_v7, %v419_v62  ;;  %v582_v14 = vmul.f32 %v575_v9, %v547_v59 }
 0x1be   : > { %565 = vst [vmem:[%s274_s23 + $0x10] sm:$0xff] %v560_v5  ;;  %v576_v11 = vmul.f32 %v570_v4, %v560_v5 }
 0x1bf   : > { %563 = vst [vmem:[%s274_s23] sm:$0xff] %v534_v10  ;;  %v574_v1 = vmul.f32 %v568_v2, %v534_v10 }
 0x1c0   : > { %v548_v12 = vpop.f32.mrf.mxu1  ;;  %v583_v13 = vmul.f32 %v576_v11, %v560_v5 }
 0x1c1   : > { %v581_v15 = vmul.f32 %v574_v1, %v534_v10  ;;  %v577_v17 = vadd.f32 %v575_v9, %v574_v1 }
 0x1c3   : > { %v561_v8 = vpop.f32.mrf.mxu2  ;;  %v578_v18 = vadd.f32 %v577_v17, %v576_v11  ;;  %v584_v6 = vadd.f32 %v582_v14, %v581_v15 }
 0x1c4   : > { %v535_v16 = vpop.f32.mrf.mxu0 }
 0x1c5   : > { %579 = vadd.xlane.f32.xlu0 %v578_v18  ;;  %v585_v19 = vadd.f32 %v584_v6, %v583_v13 }
 0x1c7   : > { %586 = vadd.xlane.f32.xlu1 %v585_v19 }
 0x238   : > { %v580_v20 = vpop.xlane.xlu0 %579 }
 0x23a   : > { %v587_v21 = vpop.xlane.xlu1 %586 }
 0x23b   : > { %v589_v22 = vsel %vm588_vm11, %v580_v20, %v587_v21 }
 0x23c   : > { %591 = vst.msk [vmem:[%s279_s25] sm:$0xff] %vm590_vm12, %v589_v22 }
 0x23d PF: > { %s16_s18 = sadd.s32 1, %s777_s18  }
 0x23e   : > { %p13_p5 = scmp.ge.s32.totalorder %s16_s18, 4  }
 0x240   :  { %15 = sbr.rel (!%p13_p5) target bundleno = 1 (0x1), region = 84 }

// kernel: res_block_pallas.8
= control target key start
LH: loop header
LB: loop body
LE: loop exit
PB: predicated region body
PF: predicated region fallthrough
CT: control target
= control target key end

     0   :  { %s702_s15 = smov 0   ;;  %s764_s0 = inlined_call_operand.vmem [shape: f32[8,768], index: 0, kind: input, shape index: {}, may-alias: {0,9}]   ;;  %s765_s1 = inlined_call_operand.vmem [shape: f32[8,256], index: 1, kind: input, shape index: {}, may-alias: {1,10}]   ;;  %s766_s2 = inlined_call_operand.vmem [shape: f32[8,1], index: 2, kind: input, shape index: {}]   ;;  %s767_s3 = inlined_call_operand.vmem [shape: f32[8,1], index: 3, kind: input, shape index: {}]   ;;  %s768_s4 = inlined_call_operand.vmem [shape: f32[8,1], index: 4, kind: input, shape index: {}]   ;;  %s769_s5 = inlined_call_operand.vmem [shape: f32[8,1], index: 5, kind: input, shape index: {}]   ;;  %s770_s6 = inlined_call_operand.vmem [shape: f32[1,768], index: 6, kind: input, shape index: {}]   ;;  %s771_s7 = inlined_call_operand.vmem [shape: f32[1,256], index: 7, kind: input, shape index: {}]   ;;  %s772_s8 = inlined_call_operand.<no memory space> [shape: f32[1], index: 8, kind: input, shape index: {}]   ;;  %s773_s9 = inlined_call_operand.vmem [shape: f32[8,768], index: 9, kind: output, shape index: {0}, may-alias: {0,9}]   ;;  %s774_s10 = inlined_call_operand.vmem [shape: f32[8,256], index: 10, kind: output, shape index: {1}, may-alias: {1,10}]  }
   0x1   :  { %16 = sst [smem:[#allocation2]] %s772_s8 }
   0x2 LB: > { %s612_s16 = sadd.s32 4294967295, %s641_s15   ;;  %p616_p0 = scmp.ge.s32.totalorder %s641_s15, 1  ;;  %s641_s15 = sphi %s702_s15, %s22_s15  }
   0x3   : > { %p344_p1 = scmp.lt.s32.totalorder %s641_s15, 3 }
   0x5   : > { %p345_p2 = pnand %p616_p0, %p344_p1 }
   0x6   : > { %p403_p3 = scmp.lt.s32.totalorder (!%p345_p2), %s612_s16, 1  ;;  %s397_s28 = smul.u32 (!%p345_p2), 3, %s612_s16 }
   0x7   : > { %348 = sbr.rel (%p345_p2) target bundleno = 147 (0x93), region = 56  ;;  %s425_s30 = sld [smem:[#allocation2]] (!%p345_p2) }
   0x8   : > { %p398_p4 = scmp.lt.s32.totalorder (!%p345_p2), %s397_s28, 5 }
   0xc   : > { %v438_v0 = vld [vmem:[%s767_s3] sm:$0xff]  ;;  %v643_v2 = vmov 0   ;;  %s716_s20 = scalar_select %p403_p3, %s612_s16, 1 }
   0xd   : > { %v429_v1 = vld [vmem:[%s766_s2] sm:$0xff]  ;;  %633 = vset.pattern.permute.xlu1 %v643_v2  ;;  %632 = vset.pattern.permute.xlu0 %v643_v2  ;;  %s776_s28 = smov (!%p398_p4, %s397_s28), 5  ;;  %v450_v14 = vstv %s425_s30 }
   0xe   : > { %441 = vperm.xlu1 %633, %v438_v0   ;;  %432 = vperm.xlu0 %632, %v429_v1   ;;  %s414_s23 = scalar_lea.vmem %s771_s7, %s716_s20  ;;  %v479_v3 = vld [vmem:[%s769_s5] sm:$0xff]  ;;  %s617_s29 = sshll.u32 %s776_s28, 3 }
   0xf   : > { %v472_v4 = vld [vmem:[%s768_s4] sm:$0xff]  ;;  %s401_s13 = scalar_lea.vmem %s764_s0, %s617_s29  ;;  %s410_s18 = scalar_lea.vmem %s770_s6, %s776_s28 }
  0x10   : > { %v426_v5 = vld [vmem:[%s401_s13] sm:$0xff]  ;;  %v427_v6 = vld [vmem:[%s401_s13 + $0x8] sm:$0xff]  ;;  %v428_v7 = vld [vmem:[%s401_s13 + $0x10] sm:$0xff]  ;;  %s618_s16 = sshll.u32 %s716_s20, 3  ;;  %s419_s25 = scalar_lea.vmem %s773_s9, %s617_s29 }
  0x11   : > { %v457_v13 = vld [vmem:[%s410_s18] sm:$0x7]  ;;  %s406_s21 = scalar_lea.vmem %s765_s1, %s618_s16  ;;  %s424_s30 = scalar_lea.vmem %s774_s10, %s618_s16 }
  0x12   : > { %v459_v18 = vperm.slane %v457_v13, 0  ;;  %v460_v19 = vperm.slane %v457_v13, 1  ;;  %v461_v20 = vperm.slane %v457_v13, 2  ;;  %v471_v24 = vld [vmem:[%s406_s21] sm:$0xff] }
  0x13   : > { %v634_v35 = vld [vmem:[%s414_s23] ss:$0 sm:$0xff] }
  0x16   : > { %482 = vperm.xlu1 %633, %v479_v3   ;;  %475 = vperm.xlu0 %632, %v472_v4  }
  0x80   : > { %v442_v8 = vpop.permute.xlu1 %441  ;;  %v433_v9 = vpop.permute.xlu0 %432 }
  0x81   : > { %v435_v10 = vmul.f32 %v433_v9, %v426_v5  ;;  %v436_v11 = vmul.f32 %v433_v9, %v427_v6  ;;  %v437_v12 = vmul.f32 %v433_v9, %v428_v7 }
  0x83   : > { %v444_v15 = vadd.f32 %v442_v8, %v435_v10  ;;  %v445_v16 = vadd.f32 %v442_v8, %v436_v11  ;;  %v446_v17 = vadd.f32 %v442_v8, %v437_v12 }
  0x85   : > { %vm447_vm0 = vcmp.gt.f32.partialorder %v444_v15, 0.0  ;;  %vm448_vm1 = vcmp.gt.f32.partialorder %v445_v16, 0.0  ;;  %vm449_vm2 = vcmp.gt.f32.partialorder %v446_v17, 0.0  ;;  %v451_v21 = vmul.f32 %v450_v14, %v444_v15 }
  0x86   : > { %v452_v22 = vmul.f32 %v450_v14, %v445_v16  ;;  %v453_v23 = vmul.f32 %v450_v14, %v446_v17 }
  0x87   : > { %v454_v25 = vsel %vm447_vm0, %v444_v15, %v451_v21 }
  0x88   : > { %v455_v26 = vsel %vm448_vm1, %v445_v16, %v452_v22  ;;  %v456_v27 = vsel %vm449_vm2, %v446_v17, %v453_v23  ;;  %v465_v28 = vmul.f32 %v459_v18, %v454_v25  ;;  %v476_v29 = vpop.permute.xlu0 %475  ;;  %v483_v33 = vpop.permute.xlu1 %482 }
  0x89   : > { %v466_v30 = vmul.f32 %v460_v19, %v455_v26  ;;  %v467_v31 = vmul.f32 %v461_v20, %v456_v27  ;;  %v478_v32 = vmul.f32 %v476_v29, %v471_v24 }
  0x8a   : > { %468 = vst [vmem:[%s419_s25] sm:$0xff] %v465_v28 }
  0x8b   : > { %469 = vst [vmem:[%s419_s25 + $0x8] sm:$0xff] %v466_v30  ;;  %v485_v34 = vadd.f32 %v483_v33, %v478_v32 }
  0x8c   : > { %470 = vst [vmem:[%s419_s25 + $0x10] sm:$0xff] %v467_v31 }
  0x8d   : > { %vm486_vm3 = vcmp.gt.f32.partialorder %v485_v34, 0.0  ;;  %v487_v36 = vmul.f32 %v485_v34, %v450_v14 }
  0x8f   : > { %v488_v37 = vsel %vm486_vm3, %v485_v34, %v487_v36 }
  0x90   : > { %v493_v38 = vmul.f32 %v634_v35, %v488_v37 }
  0x92   : > { %494 = vst [vmem:[%s424_s30] sm:$0xff] %v493_v38 }
  0x93 PF: > { %s22_s15 = sadd.s32 1, %s641_s15  }
  0x94   : > { %p19_p5 = scmp.ge.s32.totalorder %s22_s15, 4  }
  0x96   :  { %21 = sbr.rel (!%p19_p5) target bundleno = 2 (0x2), region = 107 }

// kernel: res_block_pallas.11
= control target key start
LH: loop header
LB: loop body
LE: loop exit
PB: predicated region body
PF: predicated region fallthrough
CT: control target
= control target key end

     0   :  { %s839_s23 = smov 0   ;;  %s905_s0 = inlined_call_operand.vmem [shape: f32[8,768], index: 0, kind: input, shape index: {}, may-alias: {0,11}]   ;;  %s906_s1 = inlined_call_operand.vmem [shape: f32[8,256], index: 1, kind: input, shape index: {}, may-alias: {1,12}]   ;;  %s907_s2 = inlined_call_operand.vmem [shape: f32[8,1], index: 2, kind: input, shape index: {}]   ;;  %s908_s3 = inlined_call_operand.vmem [shape: f32[8,1], index: 3, kind: input, shape index: {}]   ;;  %s909_s4 = inlined_call_operand.vmem [shape: f32[8,1], index: 4, kind: input, shape index: {}]   ;;  %s910_s5 = inlined_call_operand.vmem [shape: f32[8,1], index: 5, kind: input, shape index: {}]   ;;  %s911_s6 = inlined_call_operand.vmem [shape: f32[1,768], index: 6, kind: input, shape index: {}]   ;;  %s912_s7 = inlined_call_operand.vmem [shape: f32[1,256], index: 7, kind: input, shape index: {}]   ;;  %s913_s8 = inlined_call_operand.<no memory space> [shape: f32[1], index: 8, kind: input, shape index: {}]   ;;  %s914_s9 = inlined_call_operand.vmem [shape: f32[8,768], index: 9, kind: input, shape index: {}]   ;;  %s915_s10 = inlined_call_operand.vmem [shape: f32[8,256], index: 10, kind: input, shape index: {}]   ;;  %s916_s11 = inlined_call_operand.vmem [shape: f32[8,768], index: 11, kind: output, shape index: {0}, may-alias: {0,11}]   ;;  %s917_s12 = inlined_call_operand.vmem [shape: f32[8,256], index: 12, kind: output, shape index: {1}, may-alias: {1,12}]  }
   0x1   :  { %18 = sst [smem:[#allocation2]] %s913_s8 }
   0x2 LB: > { %s737_s24 = sadd.s32 4294967295, %s768_s23   ;;  %p741_p0 = scmp.ge.s32.totalorder %s768_s23, 1  ;;  %s768_s23 = sphi %s839_s23, %s24_s23  }
   0x3   : > { %p414_p1 = scmp.lt.s32.totalorder %s768_s23, 3 }
   0x5   : > { %p415_p2 = pnand %p741_p0, %p414_p1 }
   0x6   : > { %p486_p3 = scmp.lt.s32.totalorder (!%p415_p2), %s737_s24, 1  ;;  %s480_s18 = smul.u32 (!%p415_p2), 3, %s737_s24 }
   0x7   : > { %418 = sbr.rel (%p415_p2) target bundleno = 149 (0x95), region = 64  ;;  %s518_s20 = sld [smem:[#allocation2]] (!%p415_p2) }
   0x8   : > { %p481_p4 = scmp.lt.s32.totalorder (!%p415_p2), %s480_s18, 5 }
   0xc   : > { %v531_v0 = vld [vmem:[%s908_s3] sm:$0xff]  ;;  %v770_v2 = vmov 0   ;;  %s853_s28 = scalar_select %p486_p3, %s737_s24, 1 }
   0xd   : > { %v522_v1 = vld [vmem:[%s907_s2] sm:$0xff]  ;;  %760 = vset.pattern.permute.xlu1 %v770_v2  ;;  %759 = vset.pattern.permute.xlu0 %v770_v2  ;;  %s919_s18 = smov (!%p481_p4, %s480_s18), 5  ;;  %v543_v13 = vstv %s518_s20 }
   0xe   : > { %534 = vperm.xlu1 %760, %v531_v0   ;;  %525 = vperm.xlu0 %759, %v522_v1   ;;  %s497_s13 = scalar_lea.vmem %s912_s7, %s853_s28  ;;  %v578_v3 = vld [vmem:[%s910_s5] sm:$0xff]  ;;  %s865_s19 = sshll.u32 %s919_s18, 3 }
   0xf   : > { %v571_v4 = vld [vmem:[%s909_s4] sm:$0xff]  ;;  %s484_s25 = scalar_lea.vmem %s905_s0, %s865_s19  ;;  %s493_s24 = scalar_lea.vmem %s911_s6, %s919_s18 }
  0x10   : > { %v519_v5 = vld [vmem:[%s484_s25] sm:$0xff]  ;;  %v520_v6 = vld [vmem:[%s484_s25 + $0x8] sm:$0xff]  ;;  %v521_v7 = vld [vmem:[%s484_s25 + $0x10] sm:$0xff]  ;;  %s875_s27 = sshll.u32 %s853_s28, 3  ;;  %s502_s14 = scalar_lea.vmem %s914_s9, %s865_s19 }
  0x11   : > { %v556_v17 = vld [vmem:[%s493_s24] sm:$0x7]  ;;  %s489_s17 = scalar_lea.vmem %s906_s1, %s875_s27  ;;  %v551_v22 = vld [vmem:[%s502_s14 + $0x8] sm:$0xff]  ;;  %v552_v23 = vld [vmem:[%s502_s14 + $0x10] sm:$0xff]  ;;  %s512_s21 = scalar_lea.vmem %s916_s11, %s865_s19 }
  0x12   : > { %v550_v19 = vld [vmem:[%s502_s14] sm:$0xff]  ;;  %v558_v24 = vperm.slane %v556_v17, 0  ;;  %v559_v27 = vperm.slane %v556_v17, 1  ;;  %v560_v28 = vperm.slane %v556_v17, 2  ;;  %s507_s26 = scalar_lea.vmem %s915_s10, %s875_s27  ;;  %s517_s30 = scalar_lea.vmem %s917_s12, %s875_s27 }
  0x13   : > { %v570_v25 = vld [vmem:[%s489_s17] sm:$0xff] }
  0x14   : > { %v588_v42 = vld [vmem:[%s507_s26] sm:$0xff] }
  0x15   : > { %v761_v43 = vld [vmem:[%s497_s13] ss:$0 sm:$0xff] }
  0x16   : > { %581 = vperm.xlu1 %760, %v578_v3   ;;  %574 = vperm.xlu0 %759, %v571_v4  }
  0x80   : > { %v535_v8 = vpop.permute.xlu1 %534  ;;  %v526_v9 = vpop.permute.xlu0 %525 }
  0x81   : > { %v528_v10 = vmul.f32 %v526_v9, %v519_v5  ;;  %v529_v11 = vmul.f32 %v526_v9, %v520_v6  ;;  %v530_v12 = vmul.f32 %v526_v9, %v521_v7 }
  0x83   : > { %v537_v14 = vadd.f32 %v535_v8, %v528_v10  ;;  %v538_v15 = vadd.f32 %v535_v8, %v529_v11  ;;  %v539_v16 = vadd.f32 %v535_v8, %v530_v12 }
  0x85   : > { %vm540_vm0 = vcmp.gt.f32.partialorder %v537_v14, 0.0  ;;  %vm541_vm1 = vcmp.gt.f32.partialorder %v538_v15, 0.0  ;;  %vm542_vm2 = vcmp.gt.f32.partialorder %v539_v16, 0.0  ;;  %v544_v18 = vmul.f32 %v543_v13, %v537_v14 }
  0x86   : > { %v545_v20 = vmul.f32 %v543_v13, %v538_v15  ;;  %v546_v21 = vmul.f32 %v543_v13, %v539_v16 }
  0x87   : > { %v547_v26 = vsel %vm540_vm0, %v537_v14, %v544_v18 }
  0x88   : > { %v548_v29 = vsel %vm541_vm1, %v538_v15, %v545_v20  ;;  %v549_v30 = vsel %vm542_vm2, %v539_v16, %v546_v21  ;;  %v553_v31 = vadd.f32 %v550_v19, %v547_v26  ;;  %v575_v32 = vpop.permute.xlu0 %574  ;;  %v582_v37 = vpop.permute.xlu1 %581 }
  0x89   : > { %v554_v33 = vadd.f32 %v551_v22, %v548_v29  ;;  %v555_v34 = vadd.f32 %v552_v23, %v549_v30  ;;  %v577_v35 = vmul.f32 %v575_v32, %v570_v25 }
  0x8a   : > { %v564_v36 = vmul.f32 %v558_v24, %v553_v31 }
  0x8b   : > { %v565_v38 = vmul.f32 %v559_v27, %v554_v33  ;;  %v566_v39 = vmul.f32 %v560_v28, %v555_v34  ;;  %v584_v40 = vadd.f32 %v582_v37, %v577_v35 }
  0x8c   : > { %567 = vst [vmem:[%s512_s21] sm:$0xff] %v564_v36 }
  0x8d   : > { %568 = vst [vmem:[%s512_s21 + $0x8] sm:$0xff] %v565_v38  ;;  %vm585_vm3 = vcmp.gt.f32.partialorder %v584_v40, 0.0  ;;  %v586_v41 = vmul.f32 %v584_v40, %v543_v13 }
  0x8e   : > { %569 = vst [vmem:[%s512_s21 + $0x10] sm:$0xff] %v566_v39 }
  0x8f   : > { %v587_v44 = vsel %vm585_vm3, %v584_v40, %v586_v41 }
  0x90   : > { %v589_v45 = vadd.f32 %v588_v42, %v587_v44 }
  0x92   : > { %v594_v46 = vmul.f32 %v761_v43, %v589_v45 }
  0x94   : > { %595 = vst [vmem:[%s517_s30] sm:$0xff] %v594_v46 }
  0x95 PF: > { %s24_s23 = sadd.s32 1, %s768_s23  }
  0x96   : > { %p21_p5 = scmp.ge.s32.totalorder %s24_s23, 4  }
  0x98   :  { %23 = sbr.rel (!%p21_p5) target bundleno = 2 (0x2), region = 121 }

</bundles_post_ra>
